<compile_context>
chip_gen: v5e
topology: v5e:2x2
jax: 0.10.0
libtpu: 0.0.40
codegen_flags: <defaults>
</compile_context>

<pallas_src>
import jax
import jax.numpy as jnp
from jax.experimental import pallas as pl
from jax.experimental.pallas import tpu as pltpu

IN_FEATURES = 512
OUT_FEATURES = 660
B_TILE = 256  # batch tile used only when B > B_TILE (keeps VMEM bounded, matches MXU M)


def _fc_sigmoid_kernel(x_ref, w_ref, b_ref, o_ref):
    # x: (TB, 512) f32   w: (512, 660) bf16   b: (1, 660) f32   o: (TB, 660) f32
    w = w_ref[...].astype(jnp.float32)            # bf16 in HBM, f32 on the MXU
    acc = jnp.dot(x_ref[...], w, preferred_element_type=jnp.float32)
    acc = acc + b_ref[...]                        # broadcast (1, 660) -> (TB, 660)
    o_ref[...] = jax.nn.sigmoid(acc).astype(o_ref.dtype)


def pack_params(weight, bias):
    """One-time parameter packing (do this at init, NOT per forward call):
       weight (660, 512) f32 -> (512, 660) bf16  (transposed, NO column padding)
       bias   (660,)     f32 -> (1, 660)   f32"""
    w_t = jnp.asarray(weight, jnp.float32).T.astype(jnp.bfloat16)   # (512, 660)
    b_row = jnp.asarray(bias, jnp.float32).reshape(1, OUT_FEATURES)  # (1, 660)
    return w_t, b_row


def single_sigmoid_feature_classifier(x, w_packed, b_packed):
    """x: any shape that squeezes to (B, 512) (or (512,));
       w_packed, b_packed: outputs of pack_params().
       Returns sigmoid(squeeze(x) @ W^T + b) of shape (B, 660) (or (660,))."""
    x2 = jnp.squeeze(x)                          # mimics torch .squeeze()
    squeezed_1d = x2.ndim == 1                   # note: B==1 loses the batch dim,
    if squeezed_1d:                              # exactly like torch .squeeze()
        x2 = x2[None, :]
    assert x2.ndim == 2 and x2.shape[1] == IN_FEATURES
    x2 = x2.astype(jnp.float32)
    B = x2.shape[0]

    # Small/medium B: one full-B block, grid=(1,) (no serial grid overhead).
    # Large B: tile the batch axis; weight/bias blocks are revisited (same block
    # index every step) so they are DMA'd once and stay resident in VMEM.
    if B <= B_TILE:
        b_blk, Bp = B, B
    else:
        b_blk = B_TILE
        Bp = pl.cdiv(B, B_TILE) * B_TILE
        if Bp != B:
            x2 = jnp.pad(x2, ((0, Bp - B), (0, 0)))
    grid = (Bp // b_blk,)

    flops = 2 * Bp * IN_FEATURES * OUT_FEATURES
    bytes_accessed = (IN_FEATURES * OUT_FEATURES * 2      # bf16 weight (dominant)
                      + Bp * IN_FEATURES * 4              # f32 activations
                      + OUT_FEATURES * 4                  # f32 bias
                      + Bp * OUT_FEATURES * 4)            # f32 output

    out = pl.pallas_call(
        _fc_sigmoid_kernel,
        out_shape=jax.ShapeDtypeStruct((Bp, OUT_FEATURES), jnp.float32),
        grid_spec=pltpu.PrefetchScalarGridSpec(
            num_scalar_prefetch=0,
            grid=grid,
            in_specs=[
                pl.BlockSpec((b_blk, IN_FEATURES), lambda i: (i, 0)),
                pl.BlockSpec((IN_FEATURES, OUT_FEATURES), lambda i: (0, 0)),
                pl.BlockSpec((1, OUT_FEATURES), lambda i: (0, 0)),
            ],
            out_specs=pl.BlockSpec((b_blk, OUT_FEATURES), lambda i: (i, 0)),
        ),
        compiler_params=pltpu.CompilerParams(
            dimension_semantics=("parallel",)),
        cost_estimate=pl.CostEstimate(
            flops=flops,
            transcendentals=Bp * OUT_FEATURES,
            bytes_accessed=bytes_accessed),
    )(x2, w_packed, b_packed)

    out = out[:B]                                # drop batch padding (if any)
    if squeezed_1d:
        out = out[0]
    return out


def _init_params(key):
    """Deterministic init matching torch.nn.Linear(512, 660) shapes:
       uniform(-1/sqrt(512), 1/sqrt(512)) for both weight and bias."""
    kw, kb = jax.random.split(key)
    bound = 1.0 / (IN_FEATURES ** 0.5)
    weight = jax.random.uniform(
        kw, (OUT_FEATURES, IN_FEATURES), jnp.float32, -bound, bound)
    bias = jax.random.uniform(
        kb, (OUT_FEATURES,), jnp.float32, -bound, bound)
    return weight, bias


if __name__ == "__main__":
    key = jax.random.PRNGKey(0)
    k_x, k_p = jax.random.split(key)

    B = 2
    # Input with a singleton dim, since the module relies on .squeeze():
    x = jax.random.normal(k_x, (B, 1, IN_FEATURES), jnp.float32)
    weight, bias = _init_params(k_p)

    # One-time packing (canonical param layout: transposed, bf16, no padding).
    w_packed, b_packed = pack_params(weight, bias)
    w_packed, b_packed = jax.block_until_ready((w_packed, b_packed))

    y = single_sigmoid_feature_classifier(x, w_packed, b_packed)
    y = jax.block_until_ready(y)

    # Reference check in plain f32 JAX (only the weight is bf16-quantized).
    y_ref = jax.nn.sigmoid(jnp.squeeze(x) @ weight.T + bias)
    assert y.shape == (B, OUT_FEATURES), y.shape
    assert jnp.allclose(y, y_ref, atol=2e-2, rtol=2e-2), float(
        jnp.max(jnp.abs(y - y_ref)))

    print("KERNEL_OK")
</pallas_src>

<mosaic_0001>
module attributes {stable_mosaic.version = 11 : i64} {
  func.func @_fc_sigmoid_kernel(%arg0: i32, %arg1: memref<2x512xf32, #tpu.memory_space<vmem>>, %arg2: memref<512x660xbf16, #tpu.memory_space<vmem>>, %arg3: memref<1x660xf32, #tpu.memory_space<vmem>>, %arg4: memref<2x660xf32, #tpu.memory_space<vmem>>) attributes {dimension_semantics = [#tpu.dimension_semantics<parallel>], iteration_bounds = array<i64: 1>, scalar_prefetch = 0 : i64, scratch_operands = 0 : i64, tpu.core_type = #tpu.core_type<tc>, window_params = [{transform_indices = @transform_0, window_bounds = array<i64: 2, 512>}, {pipeline_mode = #tpu.pipeline_mode<synchronous>, transform_indices = @transform_1, window_bounds = array<i64: 512, 660>}, {pipeline_mode = #tpu.pipeline_mode<synchronous>, transform_indices = @transform_2, window_bounds = array<i64: 1, 660>}, {transform_indices = @transform_3, window_bounds = array<i64: 2, 660>}]} {
    %c0 = arith.constant 0 : index
    %c0_0 = arith.constant 0 : index
    %0 = vector.load %arg2[%c0, %c0_0] : memref<512x660xbf16, #tpu.memory_space<vmem>>, vector<512x660xbf16>
    %1 = arith.extf %0 : vector<512x660xbf16> to vector<512x660xf32>
    %c0_1 = arith.constant 0 : index
    %c0_2 = arith.constant 0 : index
    %2 = vector.load %arg1[%c0_1, %c0_2] : memref<2x512xf32, #tpu.memory_space<vmem>>, vector<2x512xf32>
    %cst = arith.constant dense<0.000000e+00> : vector<2x660xf32>
    %3 = tpu.matmul %2, %1, %cst {dimension_numbers = #tpu.dot_dimension_numbers<[1], [0], [0], [1], [0, 0, 1, 1], [], []>} : vector<2x512xf32>, vector<512x660xf32>, vector<2x660xf32> -> vector<2x660xf32>
    %c0_3 = arith.constant 0 : index
    %c0_4 = arith.constant 0 : index
    %4 = vector.load %arg3[%c0_3, %c0_4] : memref<1x660xf32, #tpu.memory_space<vmem>>, vector<1x660xf32>
    %5 = vector.broadcast %4 : vector<1x660xf32> to vector<2x660xf32>
    %6 = arith.addf %3, %5 : vector<2x660xf32>
    %7 = arith.negf %6 : vector<2x660xf32>
    %8 = math.exp %7 : vector<2x660xf32>
    %cst_5 = arith.constant 1.000000e+00 : f32
    %9 = vector.broadcast %cst_5 : f32 to vector<2x660xf32>
    %10 = arith.addf %9, %8 : vector<2x660xf32>
    %11 = arith.divf %9, %10 : vector<2x660xf32>
    %c0_6 = arith.constant 0 : index
    %c0_7 = arith.constant 0 : index
    %12 = vector.load %arg4[%c0_6, %c0_7] : memref<2x660xf32, #tpu.memory_space<vmem>>, vector<2x660xf32>
    tpu.vector_store %arg4[%c0_6, %c0_7], %11 {strides = array<i32>} : memref<2x660xf32, #tpu.memory_space<vmem>>, vector<2x660xf32>,
    return
  }
  func.func @transform_0(%arg0: i32) -> (i32, i32) {
    %c0_i32 = arith.constant 0 : i32
    %c0_i32_0 = arith.constant 0 : i32
    return %arg0, %c0_i32 : i32, i32
  }
  func.func @transform_1(%arg0: i32) -> (i32, i32) {
    %c0_i32 = arith.constant 0 : i32
    %c0_i32_0 = arith.constant 0 : i32
    %c0_i32_1 = arith.constant 0 : i32
    return %c0_i32, %c0_i32_0 : i32, i32
  }
  func.func @transform_2(%arg0: i32) -> (i32, i32) {
    %c0_i32 = arith.constant 0 : i32
    %c0_i32_0 = arith.constant 0 : i32
    %c0_i32_1 = arith.constant 0 : i32
    return %c0_i32, %c0_i32_0 : i32, i32
  }
  func.func @transform_3(%arg0: i32) -> (i32, i32) {
    %c0_i32 = arith.constant 0 : i32
    %c0_i32_0 = arith.constant 0 : i32
    return %arg0, %c0_i32 : i32, i32
  }
}

</mosaic_0001>

<bundles_post_ra>
// kernel: tpu_custom_call.1
= control target key start
LH: loop header
LB: loop body
LE: loop exit
PB: predicated region body
PF: predicated region fallthrough
CT: control target
= control target key end

     0   :  { %s2761_s0 = inlined_call_operand.vmem [shape: f32[2,512], index: 0, kind: input, shape index: {}]   ;;  %s2762_s1 = inlined_call_operand.vmem [shape: bf16[512,660], index: 1, kind: input, shape index: {}]   ;;  %s2763_s2 = inlined_call_operand.vmem [shape: f32[1,660], index: 2, kind: input, shape index: {}]   ;;  %s2764_s3 = inlined_call_operand.hbm [shape: f32[2,660], index: 3, kind: output, shape index: {}]  }
   0x1   :  { %v1334_v0 = vld [vmem:[%s2762_s1 + $0x468] sm:$0xff]  ;;  %v1344_v2 = vld [vmem:[%s2762_s1 + $0x450] sm:$0xff]  ;;  %v1370_v12 = vld [vmem:[%s2762_s1 + $0x438] sm:$0xff] }
   0x2   :  { %v1339_v1 = vld [vmem:[%s2762_s1 + $0x168] sm:$0xff]  ;;  %v489_v3 = vunpack.c.l.bf16 %v1334_v0  ;;  %v483_v5 = vunpack.c.l.bf16 %v1344_v2  ;;  %v1357_v7 = vld [vmem:[%s2762_s1 + $0x150] sm:$0xff]  ;;  %v1380_v14 = vld [vmem:[%s2762_s1 + $0x138] sm:$0xff]  ;;  %v477_v15 = vunpack.c.l.bf16 %v1370_v12 }
   0x3   :  { %v297_v4 = vunpack.c.l.bf16 %v1339_v1  ;;  %v1352_v6 = vld [vmem:[%s2762_s1 + $0x5e8] sm:$0xff]  ;;  %v291_v10 = vunpack.c.l.bf16 %v1357_v7  ;;  %v1375_v13 = vld [vmem:[%s2762_s1 + $0x5d0] sm:$0xff]  ;;  %v285_v17 = vunpack.c.l.bf16 %v1380_v14  ;;  %v1393_v19 = vld [vmem:[%s2762_s1 + $0x420] sm:$0xff] }
   0x4   :  { %v1362_v8 = vld [vmem:[%s2762_s1 + $0x2e8] sm:$0xff]  ;;  %v585_v9 = vunpack.c.l.bf16 %v1352_v6  ;;  %656 = vmatpush.msra.mxu2 %v489_v3  ;;  %v579_v16 = vunpack.c.l.bf16 %v1375_v13  ;;  %v1388_v18 = vld [vmem:[%s2762_s1 + $0x2d0] sm:$0xff]  ;;  %v1398_v20 = vld [vmem:[%s2762_s1 + $0x5b8] sm:$0xff]  ;;  %v471_v26 = vunpack.c.l.bf16 %v1393_v19 }
   0x5   :  { %v393_v11 = vunpack.c.l.bf16 %v1362_v8  ;;  %616 = vmatpush.msra.mxu0 %v297_v4  ;;  %v387_v21 = vunpack.c.l.bf16 %v1388_v18  ;;  %v573_v22 = vunpack.c.l.bf16 %v1398_v20  ;;  %v1405_v23 = vld [vmem:[%s2762_s1 + $0x120] sm:$0xff]  ;;  %v1410_v24 = vld [vmem:[%s2762_s1 + $0x2b8] sm:$0xff]  ;;  %v1415_v25 = vld [vmem:[%s2762_s1 + $0x408] sm:$0xff] }
   0x6   :  { %676 = vmatpush.msra.mxu3 %v585_v9  ;;  %657 = vmatpush.msra.mxu2 %v483_v5  ;;  %v279_v27 = vunpack.c.l.bf16 %v1405_v23  ;;  %v381_v28 = vunpack.c.l.bf16 %v1410_v24  ;;  %v1423_v29 = vld [vmem:[%s2762_s1 + $0x5a0] sm:$0xff]  ;;  %v1428_v30 = vld [vmem:[%s2762_s1 + $0x108] sm:$0xff]  ;;  %v1440_v34 = vld [vmem:[%s2762_s1 + $0x3f0] sm:$0xff]  ;;  %v465_v37 = vunpack.c.l.bf16 %v1415_v25 }
   0x7   :  { %636 = vmatpush.msra.mxu1 %v393_v11  ;;  %617 = vmatpush.msra.mxu0 %v291_v10  ;;  %v1433_v31 = vld [vmem:[%s2762_s1 + $0x2a0] sm:$0xff]  ;;  %v567_v32 = vunpack.c.l.bf16 %v1423_v29  ;;  %v1445_v35 = vld [vmem:[%s2762_s1 + $0x588] sm:$0xff]  ;;  %v1450_v36 = vld [vmem:[%s2762_s1 + $0xf0] sm:$0xff]  ;;  %v273_v38 = vunpack.c.l.bf16 %v1428_v30  ;;  %v459_v46 = vunpack.c.l.bf16 %v1440_v34 }
   0x8   :  { %677 = vmatpush.msra.mxu3 %v579_v16  ;;  %v375_v33 = vunpack.c.l.bf16 %v1433_v31  ;;  %658 = vmatpush.msra.mxu2 %v477_v15  ;;  %v1457_v39 = vld [vmem:[%s2762_s1 + $0x288] sm:$0xff]  ;;  %v1462_v40 = vld [vmem:[%s2762_s1 + $0x570] sm:$0xff]  ;;  %v561_v41 = vunpack.c.l.bf16 %v1445_v35  ;;  %v1469_v43 = vld [vmem:[%s2762_s1 + $0x3d8] sm:$0xff]  ;;  %v267_v47 = vunpack.c.l.bf16 %v1450_v36 }
   0x9   :  { %637 = vmatpush.msra.mxu1 %v387_v21  ;;  %618 = vmatpush.msra.mxu0 %v285_v17  ;;  %v369_v42 = vunpack.c.l.bf16 %v1457_v39  ;;  %v1474_v44 = vld [vmem:[%s2762_s1 + $0xd8] sm:$0xff]  ;;  %v1479_v45 = vld [vmem:[%s2762_s1 + $0x270] sm:$0xff]  ;;  %v555_v50 = vunpack.c.l.bf16 %v1462_v40  ;;  %v1498_v52 = vld [vmem:[%s2762_s1 + $0x3c0] sm:$0xff]  ;;  %v453_v54 = vunpack.c.l.bf16 %v1469_v43 }
   0xa   :  { %678 = vmatpush.msra.mxu3 %v573_v22  ;;  %659 = vmatpush.msra.mxu2 %v471_v26  ;;  %v1486_v48 = vld [vmem:[%s2762_s1 + $0x558] sm:$0xff]  ;;  %v363_v51 = vunpack.c.l.bf16 %v1479_v45  ;;  %v1503_v53 = vld [vmem:[%s2762_s1 + $0xc0] sm:$0xff]  ;;  %v261_v55 = vunpack.c.l.bf16 %v1474_v44  ;;  %v1522_v60 = vld [vmem:[%s2762_s1 + $0x3a8] sm:$0xff]  ;;  %v447_v62 = vunpack.c.l.bf16 %v1498_v52 }
   0xb   :  { %638 = vmatpush.msra.mxu1 %v381_v28  ;;  %619 = vmatpush.msra.mxu0 %v279_v27  ;;  %v1491_v49 = vld [vmem:[%s2762_s1 + $0x258] sm:$0xff]  ;;  %v1510_v56 = vld [vmem:[%s2762_s1 + $0x540] sm:$0xff]  ;;  %v549_v58 = vunpack.c.l.bf16 %v1486_v48  ;;  %v1527_v61 = vld [vmem:[%s2762_s1 + $0xa8] sm:$0xff]  ;;  %v255_v63 = vunpack.c.l.bf16 %v1503_v53  ;;  %v441_v15 = vunpack.c.l.bf16 %v1522_v60 }
   0xc   :  { %679 = vmatpush.msra.mxu3 %v567_v32  ;;  %660 = vmatpush.msra.mxu2 %v465_v37  ;;  %v1515_v57 = vld [vmem:[%s2762_s1 + $0x240] sm:$0xff]  ;;  %v357_v59 = vunpack.c.l.bf16 %v1491_v49  ;;  %v1534_v3 = vld [vmem:[%s2762_s1 + $0x528] sm:$0xff]  ;;  %v543_v5 = vunpack.c.l.bf16 %v1510_v56  ;;  %v1546_v10 = vld [vmem:[%s2762_s1 + $0x390] sm:$0xff]  ;;  %v249_v16 = vunpack.c.l.bf16 %v1527_v61 }
   0xd   :  { %639 = vmatpush.msra.mxu1 %v375_v33  ;;  %620 = vmatpush.msra.mxu0 %v273_v38  ;;  %v1539_v4 = vld [vmem:[%s2762_s1 + $0x228] sm:$0xff]  ;;  %v351_v9 = vunpack.c.l.bf16 %v1515_v57  ;;  %v1551_v11 = vld [vmem:[%s2762_s1 + $0x90] sm:$0xff]  ;;  %v537_v22 = vunpack.c.l.bf16 %v1534_v3  ;;  %v1570_v27 = vld [vmem:[%s2762_s1 + $0x378] sm:$0xff]  ;;  %v435_v32 = vunpack.c.l.bf16 %v1546_v10 }
   0xe   :  { %680 = vmatpush.msra.mxu3 %v561_v41  ;;  %661 = vmatpush.msra.mxu2 %v459_v46  ;;  %v1558_v17 = vld [vmem:[%s2762_s1 + $0x510] sm:$0xff]  ;;  %v345_v26 = vunpack.c.l.bf16 %v1539_v4  ;;  %v1575_v28 = vld [vmem:[%s2762_s1 + $0x78] sm:$0xff]  ;;  %v243_v33 = vunpack.c.l.bf16 %v1551_v11  ;;  %v1594_v46 = vld [vmem:[%s2762_s1 + $0x360] sm:$0xff] }
   0xf   :  { %640 = vmatpush.msra.mxu1 %v369_v42  ;;  %621 = vmatpush.msra.mxu0 %v267_v47  ;;  %v1563_v21 = vld [vmem:[%s2762_s1 + $0x210] sm:$0xff]  ;;  %v1582_v37 = vld [vmem:[%s2762_s1 + $0x4f8] sm:$0xff]  ;;  %v531_v41 = vunpack.c.l.bf16 %v1558_v17  ;;  %v1599_v47 = vld [vmem:[%s2762_s1 + $0x60] sm:$0xff] }
  0x10   :  { %681 = vmatpush.msra.mxu3 %v555_v50  ;;  %662 = vmatpush.msra.mxu2 %v453_v54  ;;  %v1587_v38 = vld [vmem:[%s2762_s1 + $0x1f8] sm:$0xff]  ;;  %v339_v42 = vunpack.c.l.bf16 %v1563_v21  ;;  %v429_v50 = vunpack.c.l.bf16 %v1570_v27  ;;  %v1606_v54 = vld [vmem:[%s2762_s1 + $0x4e0] sm:$0xff] }
  0x11   :  { %641 = vmatpush.msra.mxu1 %v363_v51  ;;  %622 = vmatpush.msra.mxu0 %v261_v55  ;;  %2810 = vst [vmem:[#allocation5_spill] sm:$0xff] %v1587_v38  ;;  %v237_v51 = vunpack.c.l.bf16 %v1575_v28  ;;  %v1611_v55 = vld [vmem:[%s2762_s1 + $0x1e0] sm:$0xff] }
  0x12   :  { %682 = vmatpush.msra.mxu3 %v549_v58  ;;  %663 = vmatpush.msra.mxu2 %v447_v62  ;;  %2811 = vst [vmem:[#allocation6_spill] sm:$0xff] %v1606_v54  ;;  %v525_v58 = vunpack.c.l.bf16 %v1582_v37  ;;  %v1618_v62 = vld [vmem:[%s2762_s1 + $0x348] sm:$0xff] }
  0x13   :  { %642 = vmatpush.msra.mxu1 %v357_v59  ;;  %623 = vmatpush.msra.mxu0 %v255_v63  ;;  %2812 = vst [vmem:[#allocation7_spill] sm:$0xff] %v1611_v55  ;;  %v333_v59 = vunpack.c.l.bf16 %v1587_v38  ;;  %v1623_v63 = vld [vmem:[%s2762_s1 + $0x48] sm:$0xff] }
  0x14   :  { %683 = vmatpush.msra.mxu3 %v543_v5  ;;  %664 = vmatpush.msra.mxu2 %v441_v15  ;;  %2813 = vst [vmem:[#allocation8_spill] sm:$0xff] %v1618_v62  ;;  %v1628_v5 = vld [vmem:[%s2762_s1 + $0x4c8] sm:$0xff]  ;;  %v231_v15 = vunpack.c.l.bf16 %v1599_v47 }
  0x15   :  { %643 = vmatpush.msra.mxu1 %v351_v9  ;;  %624 = vmatpush.msra.mxu0 %v249_v16  ;;  %2814 = vst [vmem:[#allocation9_spill] sm:$0xff] %v1623_v63  ;;  %v423_v9 = vunpack.c.l.bf16 %v1594_v46  ;;  %v1635_v16 = vld [vmem:[%s2762_s1 + $0x1c8] sm:$0xff] }
  0x16   :  { %684 = vmatpush.msra.mxu3 %v537_v22  ;;  %2815 = vst [vmem:[#allocation10_spill] sm:$0xff] %v1628_v5  ;;  %665 = vmatpush.msra.mxu2 %v435_v32  ;;  %v591_v22 = vld [vmem:[%s2761_s0] sm:$0xff] }
  0x17   :  { %644 = vmatpush.msra.mxu1 %v345_v26  ;;  %625 = vmatpush.msra.mxu0 %v243_v33  ;;  %2816 = vst [vmem:[#allocation11_spill] sm:$0xff] %v1635_v16 }
  0x18   :  { %8 = vsyncpa [#allocation3], 0  ;;  %685 = vmatpush.msra.mxu3 %v531_v41  ;;  %v519_v26 = vunpack.c.l.bf16 %v1606_v54  ;;  %v327_v32 = vunpack.c.l.bf16 %v1611_v55  ;;  %v1645_v33 = vld [vmem:[%s2762_s1 + $0x330] sm:$0xff]  ;;  %607 = vst [vmem:[#allocation1] ss:$4 sm:$0xff] %v591_v22  ;;  %666 = vmatpush.msra.mxu2 %v429_v50  ;;  %v417_v41 = vunpack.c.l.bf16 %v1618_v62  ;;  %v513_v22 = vunpack.c.l.bf16 %v1628_v5  ;;  %s1240_s0 = sshll.u32 %s2764_s3, 4  ;;  %s1241_s0 = int_to_ptr.hbm [resolvable:$true] %s1240_s0 }
  0x19   :  { %645 = vmatpush.msra.mxu1 %v339_v42  ;;  %2817 = vst [vmem:[#allocation12_spill] sm:$0xff] %v1645_v33  ;;  %v1650_v38 = vld [vmem:[%s2762_s1 + $0x30] sm:$0xff]  ;;  %626 = vmatpush.msra.mxu0 %v237_v51  ;;  %v225_v42 = vunpack.c.l.bf16 %v1623_v63  ;;  %v321_v50 = vunpack.c.l.bf16 %v1635_v16  ;;  %v1669_v51 = vld [vmem:[%s2762_s1 + $0x318] sm:$0xff]  ;;  %v411_v62 = vunpack.c.l.bf16 %v1645_v33 }
  0x1a   :  { %2818 = vst [vmem:[#allocation13_spill] sm:$0xff] %v1650_v38  ;;  %v1657_v55 = vld [vmem:[%s2762_s1 + $0x4b0] sm:$0xff]  ;;  %686 = vmatpush.msra.mxu3 %v525_v58  ;;  %v1674_v63 = vld [vmem:[%s2762_s1 + $0x18] sm:$0xff]  ;;  %667 = vmatpush.msra.mxu2 %v423_v9  ;;  %v219_v58 = vunpack.c.l.bf16 %v1650_v38  ;;  %v1698_v38 = vld [vmem:[%s2762_s1] sm:$0xff]  ;;  %v405_v33 = vunpack.c.l.bf16 %v1669_v51 }
  0x1b   :  { %2819 = vst [vmem:[#allocation14_spill] sm:$0xff] %v1657_v55  ;;  %v1662_v54 = vld [vmem:[%s2762_s1 + $0x1b0] sm:$0xff]  ;;  %646 = vmatpush.msra.mxu1 %v333_v59  ;;  %627 = vmatpush.msra.mxu0 %v231_v15  ;;  %v1681_v59 = vld [vmem:[%s2762_s1 + $0x498] sm:$0xff]  ;;  %v507_v5 = vunpack.c.l.bf16 %v1657_v55  ;;  %v1693_v15 = vld [vmem:[%s2762_s1 + $0x300] sm:$0xff] }
  0x1c   :  { %2820 = vst [vmem:[#allocation15_spill] sm:$0xff] %v1662_v54  ;;  %v1686_v16 = vld [vmem:[%s2762_s1 + $0x198] sm:$0xff]  ;;  %687 = vmatpush.msra.mxu3 %v519_v26  ;;  %v315_v9 = vunpack.c.l.bf16 %v1662_v54  ;;  %668 = vmatpush.msra.mxu2 %v417_v41  ;;  %v213_v26 = vunpack.c.l.bf16 %v1674_v63  ;;  %v501_v54 = vunpack.c.l.bf16 %v1681_v59  ;;  %v399_v41 = vunpack.c.l.bf16 %v1693_v15 }
  0x1d   :  { %2821 = vst [vmem:[#allocation16_spill] sm:$0xff] %v1674_v63  ;;  %647 = vmatpush.msra.mxu1 %v327_v32  ;;  %628 = vmatpush.msra.mxu0 %v225_v42  ;;  %v1705_v32 = vld [vmem:[%s2762_s1 + $0x480] sm:$0xff]  ;;  %v309_v55 = vunpack.c.l.bf16 %v1686_v16  ;;  %v207_v42 = vunpack.c.l.bf16 %v1698_v38 }
  0x1e   :  { %2822 = vst [vmem:[#allocation17_spill] sm:$0xff] %v1686_v16  ;;  %688 = vmatpush.msra.mxu3 %v513_v22  ;;  %669 = vmatpush.msra.mxu2 %v411_v62  ;;  %v1714_v63 = vld [vmem:[%s2762_s1 + $0x180] sm:$0xff]  ;;  %v490_v22 = vunpack.c.h.bf16 %v1334_v0  ;;  %v298_v62 = vunpack.c.h.bf16 %v1339_v1  ;;  %v484_v16 = vunpack.c.h.bf16 %v1344_v2  ;;  %v394_v0 = vunpack.c.h.bf16 %v1362_v8 }
  0x1f   :  { %2823 = vst [vmem:[#allocation18_spill] sm:$0xff] %v1698_v38  ;;  %648 = vmatpush.msra.mxu1 %v321_v50  ;;  %629 = vmatpush.msra.mxu0 %v219_v58  ;;  %v495_v50 = vunpack.c.l.bf16 %v1705_v32  ;;  %v586_v58 = vunpack.c.h.bf16 %v1352_v6  ;;  %v303_v38 = vunpack.c.l.bf16 %v1714_v63  ;;  %v580_v1 = vunpack.c.h.bf16 %v1375_v13 }
  0x20   :  { %689 = vmatpush.msra.mxu3 %v507_v5  ;;  %670 = vmatpush.msra.mxu2 %v405_v33  ;;  %v292_v5 = vunpack.c.h.bf16 %v1357_v7  ;;  %v478_v33 = vunpack.c.h.bf16 %v1370_v12  ;;  %v286_v6 = vunpack.c.h.bf16 %v1380_v14  ;;  %v388_v2 = vunpack.c.h.bf16 %v1388_v18 }
  0x21   :  { %649 = vmatpush.msra.mxu1 %v315_v9  ;;  %630 = vmatpush.msra.mxu0 %v213_v26  ;;  %v574_v7 = vunpack.c.h.bf16 %v1398_v20  ;;  %v280_v8 = vunpack.c.h.bf16 %v1405_v23  ;;  %v382_v12 = vunpack.c.h.bf16 %v1410_v24  ;;  %v466_v13 = vunpack.c.h.bf16 %v1415_v25  ;;  %v2826_v26 = vld [vmem:[#allocation8_spill] sm:$0xff] }
  0x22   :  { %690 = vmatpush.msra.mxu3 %v501_v54  ;;  %671 = vmatpush.msra.mxu2 %v399_v41  ;;  %v472_v54 = vunpack.c.h.bf16 %v1393_v19  ;;  %v568_v14 = vunpack.c.h.bf16 %v1423_v29  ;;  %v274_v18 = vunpack.c.h.bf16 %v1428_v30  ;;  %v376_v19 = vunpack.c.h.bf16 %v1433_v31  ;;  %v2827_v41 = vld [vmem:[#allocation6_spill] sm:$0xff] }
  0x23   :  { %650 = vmatpush.msra.mxu1 %v309_v55  ;;  %631 = vmatpush.msra.mxu0 %v207_v42  ;;  %v460_v20 = vunpack.c.h.bf16 %v1440_v34  ;;  %v562_v23 = vunpack.c.h.bf16 %v1445_v35  ;;  %v268_v24 = vunpack.c.h.bf16 %v1450_v36  ;;  %v370_v25 = vunpack.c.h.bf16 %v1457_v39  ;;  %v2828_v42 = vld [vmem:[#allocation9_spill] sm:$0xff] }
  0x24   :  { %736 = vmatpush.msrb.mxu2 %v490_v22  ;;  %691 = vmatpush.msra.mxu3 %v495_v50  ;;  %v454_v29 = vunpack.c.h.bf16 %v1469_v43  ;;  %v556_v30 = vunpack.c.h.bf16 %v1462_v40  ;;  %v262_v31 = vunpack.c.h.bf16 %v1474_v44  ;;  %v364_v34 = vunpack.c.h.bf16 %v1479_v45 }
  0x25   :  { %696 = vmatpush.msrb.mxu0 %v298_v62  ;;  %651 = vmatpush.msra.mxu1 %v303_v38  ;;  %v448_v35 = vunpack.c.h.bf16 %v1498_v52  ;;  %v550_v36 = vunpack.c.h.bf16 %v1486_v48  ;;  %v256_v39 = vunpack.c.h.bf16 %v1503_v53  ;;  %v358_v43 = vunpack.c.h.bf16 %v1491_v49  ;;  %v1751_v52 = vld.sshfl [vmem:[#allocation1 + $0x10] sm:$0xff pattern:$0x73625140] }
  0x26   :  { %756 = vmatpush.msrb.mxu3 %v586_v58  ;;  %737 = vmatpush.msrb.mxu2 %v484_v16  ;;  %v442_v40 = vunpack.c.h.bf16 %v1522_v60  ;;  %v544_v44 = vunpack.c.h.bf16 %v1510_v56  ;;  %v250_v45 = vunpack.c.h.bf16 %v1527_v61  ;;  %v352_v48 = vunpack.c.h.bf16 %v1515_v57  ;;  %v1756_v60 = vld.sshfl [vmem:[#allocation1] sm:$0xff pattern:$0x73625140]  ;;  %v1760_v61 = vld.sshfl [vmem:[#allocation1 + $0x18] sm:$0xff pattern:$0x73625140] }
  0x27   :  { %697 = vmatpush.msrb.mxu0 %v292_v5  ;;  %716 = vmatpush.msrb.mxu1 %v394_v0  ;;  %v436_v53 = vunpack.c.h.bf16 %v1546_v10  ;;  %v538_v49 = vunpack.c.h.bf16 %v1534_v3  ;;  %v244_v56 = vunpack.c.h.bf16 %v1551_v11  ;;  %v346_v38 = vunpack.c.h.bf16 %v1539_v4  ;;  %v1766_v3 = vld.sshfl [vmem:[#allocation1 + $0x8] sm:$0xff pattern:$0x73625140]  ;;  %v2825_v16 = vld [vmem:[#allocation5_spill] sm:$0xff] }
  0x28   :  { %738 = vmatpush.msrb.mxu2 %v478_v33  ;;  %757 = vmatpush.msrb.mxu3 %v580_v1  ;;  %v430_v57 = vunpack.c.h.bf16 %v1570_v27  ;;  %v532_v10 = vunpack.c.h.bf16 %v1558_v17  ;;  %2824 = vst [vmem:[#allocation19_spill] sm:$0xff] %v1766_v3  ;;  %v238_v11 = vunpack.c.h.bf16 %v1575_v28  ;;  %v340_v55 = vunpack.c.h.bf16 %v1563_v21  ;;  %v2832_v5 = vld [vmem:[#allocation13_spill] sm:$0xff]  ;;  %v2833_v33 = vld [vmem:[#allocation11_spill] sm:$0xff] }
  0x29   :  { %698 = vmatpush.msrb.mxu0 %v286_v6  ;;  %717 = vmatpush.msrb.mxu1 %v388_v2  ;;  %v424_v4 = vunpack.c.h.bf16 %v1594_v46  ;;  %v526_v27 = vunpack.c.h.bf16 %v1582_v37  ;;  %v232_v17 = vunpack.c.h.bf16 %v1599_v47  ;;  %v334_v9 = vunpack.c.h.bf16 %v2825_v16  ;;  %v2829_v46 = vld [vmem:[#allocation7_spill] sm:$0xff]  ;;  %v2830_v37 = vld [vmem:[#allocation12_spill] sm:$0xff]  ;;  %v2831_v47 = vld [vmem:[#allocation10_spill] sm:$0xff] }
  0x2a   :  { %739 = vmatpush.msrb.mxu2 %v472_v54  ;;  %758 = vmatpush.msrb.mxu3 %v574_v7  ;;  %v418_v28 = vunpack.c.h.bf16 %v2826_v26  ;;  %v520_v21 = vunpack.c.h.bf16 %v2827_v41  ;;  %v226_v22 = vunpack.c.h.bf16 %v2828_v42  ;;  %v328_v50 = vunpack.c.h.bf16 %v2829_v46  ;;  %v2834_v2 = vld [vmem:[#allocation14_spill] sm:$0xff]  ;;  %v2835_v7 = vld [vmem:[#allocation16_spill] sm:$0xff] }
  0x2b   :  { %699 = vmatpush.msrb.mxu0 %v280_v8  ;;  %718 = vmatpush.msrb.mxu1 %v382_v12  ;;  %v412_v62 = vunpack.c.h.bf16 %v2830_v37  ;;  %v514_v58 = vunpack.c.h.bf16 %v2831_v47  ;;  %v220_v0 = vunpack.c.h.bf16 %v2832_v5  ;;  %v322_v1 = vunpack.c.h.bf16 %v2833_v33  ;;  %v2836_v12 = vld [vmem:[#allocation15_spill] sm:$0xff]  ;;  %v1897_v26 = vld [vmem:[%s2762_s1 + $0x3f8] sm:$0xff]  ;;  %v1910_v42 = vld [vmem:[%s2762_s1 + $0x590] sm:$0xff] }
  0x2c   :  { %740 = vmatpush.msrb.mxu2 %v466_v13  ;;  %759 = vmatpush.msrb.mxu3 %v568_v14  ;;  %v406_v6 = vunpack.c.h.bf16 %v1669_v51  ;;  %v508_v54 = vunpack.c.h.bf16 %v2834_v2  ;;  %v214_v8 = vunpack.c.h.bf16 %v2835_v7  ;;  %v316_v13 = vunpack.c.h.bf16 %v2836_v12  ;;  %v1791_v14 = vld [vmem:[%s2762_s1 + $0x470] sm:$0xff]  ;;  %v2837_v51 = vld [vmem:[#allocation18_spill] sm:$0xff] }
  0x2d   :  { %700 = vmatpush.msrb.mxu0 %v274_v18  ;;  %719 = vmatpush.msrb.mxu1 %v376_v19  ;;  %v400_v18 = vunpack.c.h.bf16 %v1693_v15  ;;  %v502_v19 = vunpack.c.h.bf16 %v1681_v59  ;;  %v1806_v15 = vld [vmem:[%s2762_s1 + $0x458] sm:$0xff]  ;;  %v1811_v59 = vld [vmem:[%s2762_s1 + $0x5f0] sm:$0xff]  ;;  %v1922_v37 = vld [vmem:[%s2762_s1 + $0x3e0] sm:$0xff]  ;;  %v461_v47 = vunpack.c.l.bf16 %v1897_v26  ;;  %v563_v33 = vunpack.c.l.bf16 %v1910_v42 }
  0x2e   :  { %741 = vmatpush.msrb.mxu2 %v460_v20  ;;  %760 = vmatpush.msrb.mxu3 %v562_v23  ;;  %v208_v20 = vunpack.c.h.bf16 %v2837_v51  ;;  %v1799_v23 = vld [vmem:[%s2762_s1 + $0x170] sm:$0xff]  ;;  %v1934_v5 = vld [vmem:[%s2762_s1 + $0x578] sm:$0xff] }
  0x2f   :  { %701 = vmatpush.msrb.mxu0 %v268_v24  ;;  %720 = vmatpush.msrb.mxu1 %v370_v25  ;;  %v491_v24 = vunpack.c.l.bf16 %v1791_v14  ;;  %v2838_v25 = vld [vmem:[#allocation17_spill] sm:$0xff] }
  0x30   :  { %742 = vmatpush.msrb.mxu2 %v454_v29  ;;  %761 = vmatpush.msrb.mxu3 %v556_v30  ;;  %v310_v29 = vunpack.c.h.bf16 %v2838_v25  ;;  %v496_v30 = vunpack.c.h.bf16 %v1705_v32  ;;  %v587_v32 = vunpack.c.l.bf16 %v1811_v59  ;;  %v1953_v7 = vld [vmem:[%s2762_s1 + $0x278] sm:$0xff]  ;;  %v1982_v25 = vld [vmem:[%s2762_s1 + $0x548] sm:$0xff] }
  0x31   :  { %702 = vmatpush.msrb.mxu0 %v262_v31  ;;  %721 = vmatpush.msrb.mxu1 %v364_v34  ;;  %v1817_v31 = vld [vmem:[%s2762_s1 + $0x158] sm:$0xff]  ;;  %v299_v34 = vunpack.c.l.bf16 %v1799_v23 }
  0x32   :  { %743 = vmatpush.msrb.mxu2 %v448_v35  ;;  %762 = vmatpush.msrb.mxu3 %v550_v36  ;;  %v1823_v35 = vld [vmem:[%s2762_s1 + $0x440] sm:$0xff]  ;;  %v485_v36 = vunpack.c.l.bf16 %v1806_v15 }
  0x33   :  { %703 = vmatpush.msrb.mxu0 %v256_v39  ;;  %722 = vmatpush.msrb.mxu1 %v358_v43  ;;  %v1831_v39 = vld [vmem:[%s2762_s1 + $0x2f0] sm:$0xff]  ;;  %v1836_v43 = vld [vmem:[%s2762_s1 + $0x5d8] sm:$0xff] }
  0x34   :  { %744 = vmatpush.msrb.mxu2 %v442_v40  ;;  %763 = vmatpush.msrb.mxu3 %v544_v44  ;;  %v304_v40 = vunpack.c.h.bf16 %v1714_v63  ;;  %v293_v44 = vunpack.c.l.bf16 %v1817_v31  ;;  %v1855_v63 = vld [vmem:[%s2762_s1 + $0x2d8] sm:$0xff] }
  0x35   :  { %672 = vmatmul.f32.vlgmr.msra.gmra.mxu2 %v1751_v52  ;;  %704 = vmatpush.msrb.mxu0 %v250_v45  ;;  %v1843_v45 = vld [vmem:[%s2762_s1 + $0x140] sm:$0xff] }
  0x36   :  { %723 = vmatpush.msrb.mxu1 %v352_v48  ;;  %745 = vmatpush.msrb.mxu2 %v436_v53  ;;  %v1848_v48 = vld [vmem:[%s2762_s1 + $0x428] sm:$0xff]  ;;  %v479_v53 = vunpack.c.l.bf16 %v1823_v35 }
  0x37   :  { %764 = vmatpush.msrb.mxu3 %v538_v49  ;;  %632 = vmatmul.f32.vlgmr.msra.gmra.mxu0 %v1756_v60  ;;  %v1860_v49 = vld [vmem:[%s2762_s1 + $0x5c0] sm:$0xff] }
  0x38   :  { %692 = vmatmul.f32.vlgmr.msra.gmra.mxu3 %v1760_v61  ;;  %705 = vmatpush.msrb.mxu0 %v244_v56  ;;  %v395_v56 = vunpack.c.l.bf16 %v1831_v39  ;;  %v575_v16 = vunpack.c.l.bf16 %v1860_v49 }
  0x39   :  { %724 = vmatpush.msrb.mxu1 %v346_v38  ;;  %746 = vmatpush.msrb.mxu2 %v430_v57  ;;  %v581_v38 = vunpack.c.l.bf16 %v1836_v43  ;;  %v1868_v57 = vld [vmem:[%s2762_s1 + $0x128] sm:$0xff] }
  0x3a   :  { %765 = vmatpush.msrb.mxu3 %v532_v10  ;;  %652 = vmatmul.f32.vlgmr.msra.gmra.mxu1 %v1766_v3  ;;  %v1873_v10 = vld [vmem:[%s2762_s1 + $0x410] sm:$0xff] }
  0x3b   :  { %706 = vmatpush.msrb.mxu0 %v238_v11  ;;  %725 = vmatpush.msrb.mxu1 %v340_v55  ;;  %v287_v11 = vunpack.c.l.bf16 %v1843_v45  ;;  %v473_v55 = vunpack.c.l.bf16 %v1848_v48  ;;  %v467_v41 = vunpack.c.l.bf16 %v1873_v10 }
  0x3c   :  { %747 = vmatpush.msrb.mxu2 %v424_v4  ;;  %766 = vmatpush.msrb.mxu3 %v526_v27  ;;  %v1880_v4 = vld [vmem:[%s2762_s1 + $0x2c0] sm:$0xff]  ;;  %v1885_v27 = vld [vmem:[%s2762_s1 + $0x5a8] sm:$0xff] }
  0x3d   :  { %707 = vmatpush.msrb.mxu0 %v232_v17  ;;  %726 = vmatpush.msrb.mxu1 %v334_v9  ;;  %v389_v17 = vunpack.c.l.bf16 %v1855_v63  ;;  %v1892_v9 = vld [vmem:[%s2762_s1 + $0x110] sm:$0xff]  ;;  %v569_v46 = vunpack.c.l.bf16 %v1885_v27 }
  0x3e   :  { %748 = vmatpush.msrb.mxu2 %v418_v28  ;;  %767 = vmatpush.msrb.mxu3 %v520_v21  ;;  %v281_v28 = vunpack.c.l.bf16 %v1868_v57  ;;  %v1905_v21 = vld [vmem:[%s2762_s1 + $0x2a8] sm:$0xff] }
  0x3f   :  { %708 = vmatpush.msrb.mxu0 %v226_v22  ;;  %727 = vmatpush.msrb.mxu1 %v328_v50  ;;  %v383_v22 = vunpack.c.l.bf16 %v1880_v4  ;;  %v1917_v50 = vld [vmem:[%s2762_s1 + $0xf8] sm:$0xff] }
  0x40   :  { %749 = vmatpush.msrb.mxu2 %v412_v62  ;;  %768 = vmatpush.msrb.mxu3 %v514_v58  ;;  %v275_v62 = vunpack.c.l.bf16 %v1892_v9  ;;  %v1929_v58 = vld [vmem:[%s2762_s1 + $0x290] sm:$0xff]  ;;  %v269_v2 = vunpack.c.l.bf16 %v1917_v50 }
  0x41   :  { %709 = vmatpush.msrb.mxu0 %v220_v0  ;;  %728 = vmatpush.msrb.mxu1 %v322_v1  ;;  %v377_v0 = vunpack.c.l.bf16 %v1905_v21  ;;  %v1941_v1 = vld [vmem:[%s2762_s1 + $0xe0] sm:$0xff]  ;;  %v371_v12 = vunpack.c.l.bf16 %v1929_v58 }
  0x42   :  { %750 = vmatpush.msrb.mxu2 %v406_v6  ;;  %769 = vmatpush.msrb.mxu3 %v508_v54  ;;  %v1946_v6 = vld [vmem:[%s2762_s1 + $0x3c8] sm:$0xff]  ;;  %v455_v54 = vunpack.c.l.bf16 %v1922_v37  ;;  %v263_v51 = vunpack.c.l.bf16 %v1941_v1 }
  0x43   :  { %710 = vmatpush.msrb.mxu0 %v214_v8  ;;  %729 = vmatpush.msrb.mxu1 %v316_v13  ;;  %v1958_v8 = vld [vmem:[%s2762_s1 + $0x560] sm:$0xff]  ;;  %v557_v13 = vunpack.c.l.bf16 %v1934_v5 }
  0x44   :  { %751 = vmatpush.msrb.mxu2 %v400_v18  ;;  %770 = vmatpush.msrb.mxu3 %v502_v19  ;;  %v1965_v18 = vld [vmem:[%s2762_s1 + $0xc8] sm:$0xff]  ;;  %v1970_v19 = vld [vmem:[%s2762_s1 + $0x3b0] sm:$0xff] }
  0x45   :  { %752 = vmatmul.f32.vlgmr.msrb.gmra.mxu2 %v1751_v52  ;;  %711 = vmatpush.msrb.mxu0 %v208_v20  ;;  %v449_v20 = vunpack.c.l.bf16 %v1946_v6 }
  0x46   :  { %816 = vmatpush.msra.mxu2 %v491_v24  ;;  %730 = vmatpush.msrb.mxu1 %v310_v29  ;;  %v1977_v24 = vld [vmem:[%s2762_s1 + $0x260] sm:$0xff]  ;;  %v365_v29 = vunpack.c.l.bf16 %v1953_v7 }
  0x47   :  { %771 = vmatpush.msrb.mxu3 %v496_v30  ;;  %712 = vmatmul.f32.vlgmr.msrb.gmra.mxu0 %v1756_v60  ;;  %v551_v30 = vunpack.c.l.bf16 %v1958_v8 }
  0x48   :  { %772 = vmatmul.f32.vlgmr.msrb.gmra.mxu3 %v1760_v61  ;;  %776 = vmatpush.msra.mxu0 %v299_v34  ;;  %v1989_v34 = vld [vmem:[%s2762_s1 + $0xb0] sm:$0xff] }
  0x49   :  { %817 = vmatpush.msra.mxu2 %v485_v36  ;;  %836 = vmatpush.msra.mxu3 %v587_v32  ;;  %v1994_v36 = vld [vmem:[%s2762_s1 + $0x398] sm:$0xff]  ;;  %v257_v32 = vunpack.c.l.bf16 %v1965_v18 }
  0x4a   :  { %731 = vmatpush.msrb.mxu1 %v304_v40  ;;  %777 = vmatpush.msra.mxu0 %v293_v44  ;;  %v443_v40 = vunpack.c.l.bf16 %v1970_v19  ;;  %v2001_v44 = vld [vmem:[%s2762_s1 + $0x248] sm:$0xff] }
  0x4b   :  { %732 = vmatmul.f32.vlgmr.msrb.gmra.mxu1 %v1766_v3  ;;  %818 = vmatpush.msra.mxu2 %v479_v53  ;;  %v2006_v53 = vld [vmem:[%s2762_s1 + $0x530] sm:$0xff] }
  0x4c   :  { %796 = vmatpush.msra.mxu1 %v395_v56  ;;  %837 = vmatpush.msra.mxu3 %v581_v38  ;;  %v359_v56 = vunpack.c.l.bf16 %v1977_v24  ;;  %v545_v38 = vunpack.c.l.bf16 %v1982_v25 }
  0x4d   :  { %778 = vmatpush.msra.mxu0 %v287_v11  ;;  %819 = vmatpush.msra.mxu2 %v473_v55  ;;  %v2013_v11 = vld [vmem:[%s2762_s1 + $0x98] sm:$0xff]  ;;  %v2018_v55 = vld [vmem:[%s2762_s1 + $0x380] sm:$0xff] }
  0x4e   :  { %797 = vmatpush.msra.mxu1 %v389_v17  ;;  %838 = vmatpush.msra.mxu3 %v575_v16  ;;  %v251_v17 = vunpack.c.l.bf16 %v1989_v34  ;;  %v437_v16 = vunpack.c.l.bf16 %v1994_v36 }
  0x4f   :  { %779 = vmatpush.msra.mxu0 %v281_v28  ;;  %820 = vmatpush.msra.mxu2 %v467_v41  ;;  %v2025_v28 = vld [vmem:[%s2762_s1 + $0x230] sm:$0xff]  ;;  %v2030_v41 = vld [vmem:[%s2762_s1 + $0x518] sm:$0xff] }
  0x50   :  { %798 = vmatpush.msra.mxu1 %v383_v22  ;;  %839 = vmatpush.msra.mxu3 %v569_v46  ;;  %v353_v22 = vunpack.c.l.bf16 %v2001_v44  ;;  %v539_v46 = vunpack.c.l.bf16 %v2006_v53 }
  0x51   :  { %780 = vmatpush.msra.mxu0 %v275_v62  ;;  %821 = vmatpush.msra.mxu2 %v461_v47  ;;  %v2037_v62 = vld [vmem:[%s2762_s1 + $0x80] sm:$0xff]  ;;  %v2042_v47 = vld [vmem:[%s2762_s1 + $0x368] sm:$0xff] }
  0x52   :  { %799 = vmatpush.msra.mxu1 %v377_v0  ;;  %840 = vmatpush.msra.mxu3 %v563_v33  ;;  %2839 = vst [vmem:[#allocation5_spill] sm:$0xff] %v2042_v47  ;;  %v245_v0 = vunpack.c.l.bf16 %v2013_v11  ;;  %v431_v33 = vunpack.c.l.bf16 %v2018_v55 }
  0x53   :  { %781 = vmatpush.msra.mxu0 %v269_v2  ;;  %822 = vmatpush.msra.mxu2 %v455_v54  ;;  %v2049_v2 = vld [vmem:[%s2762_s1 + $0x218] sm:$0xff]  ;;  %v2054_v54 = vld [vmem:[%s2762_s1 + $0x500] sm:$0xff] }
  0x54   :  { %800 = vmatpush.msra.mxu1 %v371_v12  ;;  %841 = vmatpush.msra.mxu3 %v557_v13  ;;  %2840 = vst [vmem:[#allocation8_spill] sm:$0xff] %v2054_v54  ;;  %v347_v12 = vunpack.c.l.bf16 %v2025_v28  ;;  %v533_v13 = vunpack.c.l.bf16 %v2030_v41 }
  0x55   :  { %782 = vmatpush.msra.mxu0 %v263_v51  ;;  %823 = vmatpush.msra.mxu2 %v449_v20  ;;  %v2061_v51 = vld [vmem:[%s2762_s1 + $0x68] sm:$0xff]  ;;  %v2066_v20 = vld [vmem:[%s2762_s1 + $0x350] sm:$0xff] }
  0x56   :  { %801 = vmatpush.msra.mxu1 %v365_v29  ;;  %842 = vmatpush.msra.mxu3 %v551_v30  ;;  %2841 = vst [vmem:[#allocation6_spill] sm:$0xff] %v2061_v51  ;;  %v239_v29 = vunpack.c.l.bf16 %v2037_v62  ;;  %v425_v30 = vunpack.c.l.bf16 %v2042_v47  ;;  %v233_v3 = vunpack.c.l.bf16 %v2061_v51 }
  0x57   :  { %783 = vmatpush.msra.mxu0 %v257_v32  ;;  %824 = vmatpush.msra.mxu2 %v443_v40  ;;  %2842 = vst [vmem:[#allocation9_spill] sm:$0xff] %v2066_v20  ;;  %v2073_v32 = vld [vmem:[%s2762_s1 + $0x200] sm:$0xff]  ;;  %v2078_v40 = vld [vmem:[%s2762_s1 + $0x4e8] sm:$0xff] }
  0x58   :  { %802 = vmatpush.msra.mxu1 %v359_v56  ;;  %843 = vmatpush.msra.mxu3 %v545_v38  ;;  %2843 = vst [vmem:[#allocation7_spill] sm:$0xff] %v2073_v32  ;;  %v341_v56 = vunpack.c.l.bf16 %v2049_v2  ;;  %v527_v38 = vunpack.c.l.bf16 %v2054_v54  ;;  %v2102_v54 = vld [vmem:[%s2762_s1 + $0x4d0] sm:$0xff]  ;;  %v335_v47 = vunpack.c.l.bf16 %v2073_v32 }
  0x59   :  { %784 = vmatpush.msra.mxu0 %v251_v17  ;;  %825 = vmatpush.msra.mxu2 %v437_v16  ;;  %2844 = vst [vmem:[#allocation12_spill] sm:$0xff] %v2078_v40  ;;  %v2085_v17 = vld [vmem:[%s2762_s1 + $0x50] sm:$0xff]  ;;  %v2090_v16 = vld [vmem:[%s2762_s1 + $0x338] sm:$0xff] }
  0x5a   :  { %803 = vmatpush.msra.mxu1 %v353_v22  ;;  %844 = vmatpush.msra.mxu3 %v539_v46  ;;  %2845 = vst [vmem:[#allocation10_spill] sm:$0xff] %v2085_v17  ;;  %v419_v22 = vunpack.c.l.bf16 %v2066_v20  ;;  %v2097_v46 = vld [vmem:[%s2762_s1 + $0x1e8] sm:$0xff]  ;;  %v2114_v20 = vld [vmem:[%s2762_s1 + $0x320] sm:$0xff]  ;;  %v227_v51 = vunpack.c.l.bf16 %v2085_v17 }
  0x5b   :  { %2846 = vst [vmem:[#allocation13_spill] sm:$0xff] %v2090_v16  ;;  %785 = vmatpush.msra.mxu0 %v245_v0  ;;  %826 = vmatpush.msra.mxu2 %v431_v33  ;;  %v521_v0 = vunpack.c.l.bf16 %v2078_v40  ;;  %v2109_v33 = vld [vmem:[%s2762_s1 + $0x38] sm:$0xff]  ;;  %v329_v32 = vunpack.c.l.bf16 %v2097_v46 }
  0x5c   :  { %2847 = vst [vmem:[#allocation11_spill] sm:$0xff] %v2097_v46  ;;  %804 = vmatpush.msra.mxu1 %v347_v12  ;;  %845 = vmatpush.msra.mxu3 %v533_v13  ;;  %v413_v12 = vunpack.c.l.bf16 %v2090_v16  ;;  %v2121_v13 = vld [vmem:[%s2762_s1 + $0x1d0] sm:$0xff]  ;;  %v2126_v40 = vld [vmem:[%s2762_s1 + $0x4b8] sm:$0xff]  ;;  %v2138_v16 = vld [vmem:[%s2762_s1 + $0x308] sm:$0xff]  ;;  %v221_v17 = vunpack.c.l.bf16 %v2109_v33 }
  0x5d   :  { %2848 = vst [vmem:[#allocation14_spill] sm:$0xff] %v2102_v54  ;;  %786 = vmatpush.msra.mxu0 %v239_v29  ;;  %827 = vmatpush.msra.mxu2 %v425_v30  ;;  %v515_v29 = vunpack.c.l.bf16 %v2102_v54  ;;  %v2133_v30 = vld [vmem:[%s2762_s1 + $0x20] sm:$0xff]  ;;  %v323_v46 = vunpack.c.l.bf16 %v2121_v13 }
  0x5e   :  { %2849 = vst [vmem:[#allocation16_spill] sm:$0xff] %v2109_v33  ;;  %805 = vmatpush.msra.mxu1 %v341_v56  ;;  %846 = vmatpush.msra.mxu3 %v527_v38  ;;  %v407_v56 = vunpack.c.l.bf16 %v2114_v20  ;;  %v2145_v38 = vld [vmem:[%s2762_s1 + $0x1b8] sm:$0xff]  ;;  %v2150_v54 = vld [vmem:[%s2762_s1 + $0x4a0] sm:$0xff]  ;;  %v401_v33 = vunpack.c.l.bf16 %v2138_v16 }
  0x5f   :  { %2850 = vst [vmem:[#allocation15_spill] sm:$0xff] %v2114_v20  ;;  %787 = vmatpush.msra.mxu0 %v233_v3  ;;  %828 = vmatpush.msra.mxu2 %v419_v22  ;;  %v509_v3 = vunpack.c.l.bf16 %v2126_v40  ;;  %v2157_v22 = vld [vmem:[%s2762_s1 + $0x8] sm:$0xff]  ;;  %v215_v20 = vunpack.c.l.bf16 %v2133_v30 }
  0x60   :  { %2851 = vst [vmem:[#allocation18_spill] sm:$0xff] %v2126_v40  ;;  %806 = vmatpush.msra.mxu1 %v335_v47  ;;  %847 = vmatpush.msra.mxu3 %v521_v0  ;;  %v2164_v47 = vld [vmem:[%s2762_s1 + $0x1a0] sm:$0xff]  ;;  %v2169_v0 = vld [vmem:[%s2762_s1 + $0x488] sm:$0xff]  ;;  %v317_v40 = vunpack.c.l.bf16 %v2145_v38 }
  0x61   :  { %2852 = vst [vmem:[#allocation17_spill] sm:$0xff] %v2133_v30  ;;  %788 = vmatpush.msra.mxu0 %v227_v51  ;;  %829 = vmatpush.msra.mxu2 %v413_v12  ;;  %v503_v51 = vunpack.c.l.bf16 %v2150_v54  ;;  %v492_v12 = vunpack.c.h.bf16 %v1791_v14  ;;  %v2178_v30 = vld [vmem:[%s2762_s1 + $0x188] sm:$0xff]  ;;  %v588_v14 = vunpack.c.h.bf16 %v1811_v59  ;;  %v390_v59 = vunpack.c.h.bf16 %v1855_v63 }
  0x62   :  { %2853 = vst [vmem:[#allocation20_spill] sm:$0xff] %v2138_v16  ;;  %807 = vmatpush.msra.mxu1 %v329_v32  ;;  %848 = vmatpush.msra.mxu3 %v515_v29  ;;  %v209_v16 = vunpack.c.l.bf16 %v2157_v22  ;;  %v311_v32 = vunpack.c.l.bf16 %v2164_v47  ;;  %v497_v29 = vunpack.c.l.bf16 %v2169_v0  ;;  %v276_v63 = vunpack.c.h.bf16 %v1892_v9 }
  0x63   :  { %2854 = vst [vmem:[#allocation21_spill] sm:$0xff] %v2157_v22  ;;  %789 = vmatpush.msra.mxu0 %v221_v17  ;;  %830 = vmatpush.msra.mxu2 %v407_v56  ;;  %v300_v17 = vunpack.c.h.bf16 %v1799_v23  ;;  %v486_v56 = vunpack.c.h.bf16 %v1806_v15  ;;  %v305_v22 = vunpack.c.l.bf16 %v2178_v30  ;;  %v582_v23 = vunpack.c.h.bf16 %v1836_v43 }
  0x64   :  { %808 = vmatpush.msra.mxu1 %v323_v46  ;;  %849 = vmatpush.msra.mxu3 %v509_v3  ;;  %v294_v46 = vunpack.c.h.bf16 %v1817_v31  ;;  %v396_v3 = vunpack.c.h.bf16 %v1831_v39  ;;  %v288_v15 = vunpack.c.h.bf16 %v1843_v45  ;;  %v576_v31 = vunpack.c.h.bf16 %v1860_v49 }
  0x65   :  { %790 = vmatpush.msra.mxu0 %v215_v20  ;;  %831 = vmatpush.msra.mxu2 %v401_v33  ;;  %v480_v20 = vunpack.c.h.bf16 %v1823_v35  ;;  %v282_v39 = vunpack.c.h.bf16 %v1868_v57  ;;  %v384_v35 = vunpack.c.h.bf16 %v1880_v4  ;;  %v468_v43 = vunpack.c.h.bf16 %v1873_v10 }
  0x66   :  { %809 = vmatpush.msra.mxu1 %v317_v40  ;;  %850 = vmatpush.msra.mxu3 %v503_v51  ;;  %v474_v40 = vunpack.c.h.bf16 %v1848_v48  ;;  %v570_v45 = vunpack.c.h.bf16 %v1885_v27  ;;  %v378_v48 = vunpack.c.h.bf16 %v1905_v21  ;;  %v462_v49 = vunpack.c.h.bf16 %v1897_v26  ;;  %v2859_v51 = vld [vmem:[#allocation19_spill] sm:$0xff] }
  0x67   :  { %896 = vmatpush.msrb.mxu2 %v492_v12  ;;  %791 = vmatpush.msra.mxu0 %v209_v16  ;;  %v564_v57 = vunpack.c.h.bf16 %v1910_v42  ;;  %v270_v4 = vunpack.c.h.bf16 %v1917_v50  ;;  %v372_v10 = vunpack.c.h.bf16 %v1929_v58  ;;  %v456_v27 = vunpack.c.h.bf16 %v1922_v37  ;;  %v2856_v16 = vld [vmem:[#allocation8_spill] sm:$0xff]  ;;  %v2860_v12 = vld [vmem:[#allocation9_spill] sm:$0xff] }
  0x68   :  { %810 = vmatpush.msra.mxu1 %v311_v32  ;;  %851 = vmatpush.msra.mxu3 %v497_v29  ;;  %v558_v9 = vunpack.c.h.bf16 %v1934_v5  ;;  %v264_v21 = vunpack.c.h.bf16 %v1941_v1  ;;  %v366_v26 = vunpack.c.h.bf16 %v1953_v7  ;;  %v450_v42 = vunpack.c.h.bf16 %v1946_v6  ;;  %v2861_v32 = vld [vmem:[#allocation12_spill] sm:$0xff]  ;;  %v2862_v29 = vld [vmem:[#allocation10_spill] sm:$0xff] }
  0x69   :  { %856 = vmatpush.msrb.mxu0 %v300_v17  ;;  %897 = vmatpush.msrb.mxu2 %v486_v56  ;;  %v552_v50 = vunpack.c.h.bf16 %v1958_v8  ;;  %v258_v58 = vunpack.c.h.bf16 %v1965_v18  ;;  %v360_v37 = vunpack.c.h.bf16 %v1977_v24  ;;  %v444_v5 = vunpack.c.h.bf16 %v1970_v19  ;;  %v2863_v56 = vld [vmem:[#allocation11_spill] sm:$0xff] }
  0x6a   :  { %916 = vmatpush.msrb.mxu3 %v588_v14  ;;  %811 = vmatpush.msra.mxu1 %v305_v22  ;;  %v546_v1 = vunpack.c.h.bf16 %v1982_v25  ;;  %v252_v7 = vunpack.c.h.bf16 %v1989_v34  ;;  %v354_v6 = vunpack.c.h.bf16 %v2001_v44  ;;  %v438_v8 = vunpack.c.h.bf16 %v1994_v36  ;;  %v2858_v22 = vld [vmem:[#allocation7_spill] sm:$0xff] }
  0x6b   :  { %857 = vmatpush.msrb.mxu0 %v294_v46  ;;  %898 = vmatpush.msrb.mxu2 %v480_v20  ;;  %v540_v18 = vunpack.c.h.bf16 %v2006_v53  ;;  %v246_v19 = vunpack.c.h.bf16 %v2013_v11  ;;  %v348_v24 = vunpack.c.h.bf16 %v2025_v28  ;;  %v432_v25 = vunpack.c.h.bf16 %v2018_v55  ;;  %v2855_v53 = vld [vmem:[#allocation5_spill] sm:$0xff]  ;;  %v2857_v55 = vld [vmem:[#allocation6_spill] sm:$0xff] }
  0x6c   :  { %876 = vmatpush.msrb.mxu1 %v396_v3  ;;  %917 = vmatpush.msrb.mxu3 %v582_v23  ;;  %v534_v34 = vunpack.c.h.bf16 %v2030_v41  ;;  %v240_v36 = vunpack.c.h.bf16 %v2037_v62  ;;  %v342_v44 = vunpack.c.h.bf16 %v2049_v2  ;;  %v426_v11 = vunpack.c.h.bf16 %v2855_v53  ;;  %v2864_v46 = vld [vmem:[#allocation13_spill] sm:$0xff]  ;;  %v2865_v20 = vld [vmem:[#allocation14_spill] sm:$0xff] }
  0x6d   :  { %858 = vmatpush.msrb.mxu0 %v288_v15  ;;  %899 = vmatpush.msrb.mxu2 %v474_v40  ;;  %v528_v28 = vunpack.c.h.bf16 %v2856_v16  ;;  %v234_v33 = vunpack.c.h.bf16 %v2857_v55  ;;  %v336_v41 = vunpack.c.h.bf16 %v2858_v22  ;;  %v420_v62 = vunpack.c.h.bf16 %v2860_v12  ;;  %v2866_v15 = vld [vmem:[#allocation16_spill] sm:$0xff]  ;;  %v2353_v55 = vld [vmem:[%s2762_s1 + $0x400] sm:$0xff]  ;;  %v2366_v12 = vld [vmem:[%s2762_s1 + $0x598] sm:$0xff] }
  0x6e   :  { %877 = vmatpush.msrb.mxu1 %v390_v59  ;;  %918 = vmatpush.msrb.mxu3 %v576_v31  ;;  %v522_v2 = vunpack.c.h.bf16 %v2861_v32  ;;  %v228_v17 = vunpack.c.h.bf16 %v2862_v29  ;;  %v330_v14 = vunpack.c.h.bf16 %v2863_v56  ;;  %v414_v3 = vunpack.c.h.bf16 %v2864_v46  ;;  %v2867_v31 = vld [vmem:[#allocation15_spill] sm:$0xff]  ;;  %v2341_v53 = vld [vmem:[%s2762_s1 + $0x5b0] sm:$0xff]  ;;  %v2385_v56 = vld [vmem:[%s2762_s1 + $0x298] sm:$0xff] }
  0x6f   :  { %859 = vmatpush.msrb.mxu0 %v282_v39  ;;  %900 = vmatpush.msrb.mxu2 %v468_v43  ;;  %v516_v23 = vunpack.c.h.bf16 %v2865_v20  ;;  %v222_v59 = vunpack.c.h.bf16 %v2866_v15  ;;  %v324_v40 = vunpack.c.h.bf16 %v2121_v13  ;;  %v408_v39 = vunpack.c.h.bf16 %v2867_v31  ;;  %v2870_v13 = vld [vmem:[#allocation20_spill] sm:$0xff]  ;;  %v2373_v32 = vld [vmem:[%s2762_s1 + $0x100] sm:$0xff] }
  0x70   :  { %878 = vmatpush.msrb.mxu1 %v384_v35  ;;  %919 = vmatpush.msrb.mxu3 %v570_v45  ;;  %v2868_v35 = vld [vmem:[#allocation18_spill] sm:$0xff]  ;;  %v2869_v45 = vld [vmem:[#allocation17_spill] sm:$0xff]  ;;  %v2397_v20 = vld [vmem:[%s2762_s1 + $0xe8] sm:$0xff]  ;;  %v271_v15 = vunpack.c.l.bf16 %v2373_v32 }
  0x71   :  { %860 = vmatpush.msrb.mxu0 %v276_v63  ;;  %901 = vmatpush.msrb.mxu2 %v462_v49  ;;  %v510_v43 = vunpack.c.h.bf16 %v2868_v35  ;;  %v216_v63 = vunpack.c.h.bf16 %v2869_v45  ;;  %v2247_v49 = vld [vmem:[%s2762_s1 + $0x478] sm:$0xff]  ;;  %v2414_v31 = vld [vmem:[%s2762_s1 + $0x568] sm:$0xff] }
  0x72   :  { %879 = vmatpush.msrb.mxu1 %v378_v48  ;;  %920 = vmatpush.msrb.mxu3 %v564_v57  ;;  %v318_v48 = vunpack.c.h.bf16 %v2145_v38  ;;  %v402_v57 = vunpack.c.h.bf16 %v2870_v13  ;;  %v493_v38 = vunpack.c.l.bf16 %v2247_v49  ;;  %v2426_v45 = vld [vmem:[%s2762_s1 + $0x3b8] sm:$0xff]  ;;  %v2433_v13 = vld [vmem:[%s2762_s1 + $0x268] sm:$0xff] }
  0x73   :  { %861 = vmatpush.msrb.mxu0 %v270_v4  ;;  %902 = vmatpush.msrb.mxu2 %v456_v27  ;;  %v504_v4 = vunpack.c.h.bf16 %v2150_v54  ;;  %v2267_v54 = vld [vmem:[%s2762_s1 + $0x5f8] sm:$0xff] }
  0x74   :  { %880 = vmatpush.msrb.mxu1 %v372_v10  ;;  %921 = vmatpush.msrb.mxu3 %v558_v9  ;;  %v2871_v10 = vld [vmem:[#allocation21_spill] sm:$0xff] }
  0x75   :  { %862 = vmatpush.msrb.mxu0 %v264_v21  ;;  %903 = vmatpush.msrb.mxu2 %v450_v42  ;;  %v210_v27 = vunpack.c.h.bf16 %v2871_v10  ;;  %v2255_v9 = vld [vmem:[%s2762_s1 + $0x178] sm:$0xff]  ;;  %v312_v21 = vunpack.c.h.bf16 %v2164_v47  ;;  %v498_v42 = vunpack.c.h.bf16 %v2169_v0  ;;  %v589_v0 = vunpack.c.l.bf16 %v2267_v54 }
  0x76   :  { %881 = vmatpush.msrb.mxu1 %v366_v26  ;;  %922 = vmatpush.msrb.mxu3 %v552_v50  ;;  %v2262_v26 = vld [vmem:[%s2762_s1 + $0x460] sm:$0xff]  ;;  %v301_v47 = vunpack.c.l.bf16 %v2255_v9  ;;  %v553_v10 = vunpack.c.l.bf16 %v2414_v31 }
  0x77   :  { %863 = vmatpush.msrb.mxu0 %v258_v58  ;;  %904 = vmatpush.msrb.mxu2 %v444_v5  ;;  %v2273_v50 = vld [vmem:[%s2762_s1 + $0x160] sm:$0xff]  ;;  %v2279_v58 = vld [vmem:[%s2762_s1 + $0x448] sm:$0xff]  ;;  %v2287_v5 = vld [vmem:[%s2762_s1 + $0x2f8] sm:$0xff] }
  0x78   :  { %882 = vmatpush.msrb.mxu1 %v360_v37  ;;  %923 = vmatpush.msrb.mxu3 %v546_v1  ;;  %v487_v37 = vunpack.c.l.bf16 %v2262_v26  ;;  %v2292_v1 = vld [vmem:[%s2762_s1 + $0x5e0] sm:$0xff] }
  0x79   :  { %832 = vmatmul.f32.vlgmr.msra.gmra.mxu2 %v1751_v52  ;;  %864 = vmatpush.msrb.mxu0 %v252_v7  ;;  %v306_v7 = vunpack.c.h.bf16 %v2178_v30  ;;  %v2311_v30 = vld [vmem:[%s2762_s1 + $0x2e0] sm:$0xff] }
  0x7a   :  { %883 = vmatpush.msrb.mxu1 %v354_v6  ;;  %905 = vmatpush.msrb.mxu2 %v438_v8  ;;  %v2299_v6 = vld [vmem:[%s2762_s1 + $0x148] sm:$0xff]  ;;  %v2304_v8 = vld [vmem:[%s2762_s1 + $0x430] sm:$0xff] }
  0x7b   :  { %924 = vmatpush.msrb.mxu3 %v540_v18  ;;  %792 = vmatmul.f32.vlgmr.msra.gmra.mxu0 %v1756_v60  ;;  %v481_v18 = vunpack.c.l.bf16 %v2279_v58 }
  0x7c   :  { %852 = vmatmul.f32.vlgmr.msra.gmra.mxu3 %v1760_v61  ;;  %865 = vmatpush.msrb.mxu0 %v246_v19  ;;  %v2316_v19 = vld [vmem:[%s2762_s1 + $0x5c8] sm:$0xff] }
  0x7d   :  { %884 = vmatpush.msrb.mxu1 %v348_v24  ;;  %906 = vmatpush.msrb.mxu2 %v432_v25  ;;  %v397_v24 = vunpack.c.l.bf16 %v2287_v5  ;;  %v583_v25 = vunpack.c.l.bf16 %v2292_v1  ;;  %v577_v16 = vunpack.c.l.bf16 %v2316_v19 }
  0x7e   :  { %925 = vmatpush.msrb.mxu3 %v534_v34  ;;  %812 = vmatmul.f32.vlgmr.msra.gmra.mxu1 %v2859_v51  ;;  %v2329_v34 = vld [vmem:[%s2762_s1 + $0x418] sm:$0xff] }
  0x7f   :  { %866 = vmatpush.msrb.mxu0 %v240_v36  ;;  %885 = vmatpush.msrb.mxu1 %v342_v44  ;;  %v289_v36 = vunpack.c.l.bf16 %v2299_v6  ;;  %v2336_v44 = vld [vmem:[%s2762_s1 + $0x2c8] sm:$0xff]  ;;  %v469_v22 = vunpack.c.l.bf16 %v2329_v34 }
  0x80   :  { %907 = vmatpush.msrb.mxu2 %v426_v11  ;;  %926 = vmatpush.msrb.mxu3 %v528_v28  ;;  %v391_v11 = vunpack.c.l.bf16 %v2311_v30  ;;  %v2348_v28 = vld [vmem:[%s2762_s1 + $0x118] sm:$0xff] }
  0x81   :  { %867 = vmatpush.msrb.mxu0 %v234_v33  ;;  %886 = vmatpush.msrb.mxu1 %v336_v41  ;;  %v2361_v41 = vld [vmem:[%s2762_s1 + $0x2b0] sm:$0xff]  ;;  %v277_v29 = vunpack.c.l.bf16 %v2348_v28 }
  0x82   :  { %908 = vmatpush.msrb.mxu2 %v420_v62  ;;  %927 = vmatpush.msrb.mxu3 %v522_v2  ;;  %v385_v62 = vunpack.c.l.bf16 %v2336_v44  ;;  %v2378_v2 = vld [vmem:[%s2762_s1 + $0x3e8] sm:$0xff]  ;;  %v379_v46 = vunpack.c.l.bf16 %v2361_v41 }
  0x83   :  { %868 = vmatpush.msrb.mxu0 %v228_v17  ;;  %887 = vmatpush.msrb.mxu1 %v330_v14  ;;  %v463_v17 = vunpack.c.l.bf16 %v2353_v55  ;;  %v2390_v14 = vld [vmem:[%s2762_s1 + $0x580] sm:$0xff] }
  0x84   :  { %909 = vmatpush.msrb.mxu2 %v414_v3  ;;  %928 = vmatpush.msrb.mxu3 %v516_v23  ;;  %v565_v3 = vunpack.c.l.bf16 %v2366_v12  ;;  %v2402_v23 = vld [vmem:[%s2762_s1 + $0x3d0] sm:$0xff]  ;;  %v559_v35 = vunpack.c.l.bf16 %v2390_v14 }
  0x85   :  { %869 = vmatpush.msrb.mxu0 %v222_v59  ;;  %888 = vmatpush.msrb.mxu1 %v324_v40  ;;  %v457_v59 = vunpack.c.l.bf16 %v2378_v2  ;;  %v2409_v40 = vld [vmem:[%s2762_s1 + $0x280] sm:$0xff] }
  0x86   :  { %910 = vmatpush.msrb.mxu2 %v408_v39  ;;  %929 = vmatpush.msrb.mxu3 %v510_v43  ;;  %v373_v39 = vunpack.c.l.bf16 %v2385_v56  ;;  %v2421_v43 = vld [vmem:[%s2762_s1 + $0xd0] sm:$0xff] }
  0x87   :  { %870 = vmatpush.msrb.mxu0 %v216_v63  ;;  %889 = vmatpush.msrb.mxu1 %v318_v48  ;;  %v265_v63 = vunpack.c.l.bf16 %v2397_v20  ;;  %v451_v48 = vunpack.c.l.bf16 %v2402_v23 }
  0x88   :  { %911 = vmatpush.msrb.mxu2 %v402_v57  ;;  %930 = vmatpush.msrb.mxu3 %v504_v4  ;;  %v2438_v57 = vld [vmem:[%s2762_s1 + $0x550] sm:$0xff]  ;;  %v367_v4 = vunpack.c.l.bf16 %v2409_v40 }
  0x89   :  { %912 = vmatmul.f32.vlgmr.msrb.gmra.mxu2 %v1751_v52  ;;  %871 = vmatpush.msrb.mxu0 %v210_v27  ;;  %v295_v52 = vunpack.c.l.bf16 %v2273_v50  ;;  %v2445_v27 = vld [vmem:[%s2762_s1 + $0xb8] sm:$0xff] }
  0x8a   :  { %976 = vmatpush.msra.mxu2 %v493_v38  ;;  %890 = vmatpush.msrb.mxu1 %v312_v21  ;;  %v2450_v38 = vld [vmem:[%s2762_s1 + $0x3a0] sm:$0xff]  ;;  %v259_v21 = vunpack.c.l.bf16 %v2421_v43 }
  0x8b   :  { %931 = vmatpush.msrb.mxu3 %v498_v42  ;;  %872 = vmatmul.f32.vlgmr.msrb.gmra.mxu0 %v1756_v60  ;;  %v2324_v60 = vld [vmem:[%s2762_s1 + $0x130] sm:$0xff]  ;;  %v445_v42 = vunpack.c.l.bf16 %v2426_v45 }
  0x8c   :  { %932 = vmatmul.f32.vlgmr.msrb.gmra.mxu3 %v1760_v61  ;;  %936 = vmatpush.msra.mxu0 %v301_v47  ;;  %v475_v61 = vunpack.c.l.bf16 %v2304_v8  ;;  %v283_v33 = vunpack.c.l.bf16 %v2324_v60  ;;  %v2457_v47 = vld [vmem:[%s2762_s1 + $0x250] sm:$0xff] }
  0x8d   :  { %977 = vmatpush.msra.mxu2 %v487_v37  ;;  %996 = vmatpush.msra.mxu3 %v589_v0  ;;  %v2462_v37 = vld [vmem:[%s2762_s1 + $0x538] sm:$0xff]  ;;  %v361_v0 = vunpack.c.l.bf16 %v2433_v13 }
  0x8e   :  { %891 = vmatpush.msrb.mxu1 %v306_v7  ;;  %937 = vmatpush.msra.mxu0 %v295_v52  ;;  %v547_v7 = vunpack.c.l.bf16 %v2438_v57  ;;  %v2469_v52 = vld [vmem:[%s2762_s1 + $0xa0] sm:$0xff] }
  0x8f   :  { %892 = vmatmul.f32.vlgmr.msrb.gmra.mxu1 %v2859_v51  ;;  %978 = vmatpush.msra.mxu2 %v481_v18  ;;  %v571_v51 = vunpack.c.l.bf16 %v2341_v53  ;;  %v2474_v18 = vld [vmem:[%s2762_s1 + $0x388] sm:$0xff] }
  0x90   :  { %956 = vmatpush.msra.mxu1 %v397_v24  ;;  %997 = vmatpush.msra.mxu3 %v583_v25  ;;  %v253_v24 = vunpack.c.l.bf16 %v2445_v27  ;;  %v439_v25 = vunpack.c.l.bf16 %v2450_v38 }
  0x91   :  { %938 = vmatpush.msra.mxu0 %v289_v36  ;;  %979 = vmatpush.msra.mxu2 %v475_v61  ;;  %v2481_v36 = vld [vmem:[%s2762_s1 + $0x238] sm:$0xff]  ;;  %v2486_v61 = vld [vmem:[%s2762_s1 + $0x520] sm:$0xff] }
  0x92   :  { %957 = vmatpush.msra.mxu1 %v391_v11  ;;  %998 = vmatpush.msra.mxu3 %v577_v16  ;;  %v355_v11 = vunpack.c.l.bf16 %v2457_v47  ;;  %v541_v16 = vunpack.c.l.bf16 %v2462_v37 }
  0x93   :  { %939 = vmatpush.msra.mxu0 %v283_v33  ;;  %980 = vmatpush.msra.mxu2 %v469_v22  ;;  %v2493_v33 = vld [vmem:[%s2762_s1 + $0x88] sm:$0xff]  ;;  %v2498_v22 = vld [vmem:[%s2762_s1 + $0x370] sm:$0xff] }
  0x94   :  { %958 = vmatpush.msra.mxu1 %v385_v62  ;;  %999 = vmatpush.msra.mxu3 %v571_v51  ;;  %v247_v62 = vunpack.c.l.bf16 %v2469_v52  ;;  %v433_v51 = vunpack.c.l.bf16 %v2474_v18 }
  0x95   :  { %940 = vmatpush.msra.mxu0 %v277_v29  ;;  %981 = vmatpush.msra.mxu2 %v463_v17  ;;  %v2505_v29 = vld [vmem:[%s2762_s1 + $0x220] sm:$0xff]  ;;  %v2510_v17 = vld [vmem:[%s2762_s1 + $0x508] sm:$0xff] }
  0x96   :  { %959 = vmatpush.msra.mxu1 %v379_v46  ;;  %1000 = vmatpush.msra.mxu3 %v565_v3  ;;  %v349_v46 = vunpack.c.l.bf16 %v2481_v36  ;;  %v535_v3 = vunpack.c.l.bf16 %v2486_v61 }
  0x97   :  { %941 = vmatpush.msra.mxu0 %v271_v15  ;;  %982 = vmatpush.msra.mxu2 %v457_v59  ;;  %v2517_v15 = vld [vmem:[%s2762_s1 + $0x70] sm:$0xff]  ;;  %v2522_v59 = vld [vmem:[%s2762_s1 + $0x358] sm:$0xff] }
  0x98   :  { %960 = vmatpush.msra.mxu1 %v373_v39  ;;  %1001 = vmatpush.msra.mxu3 %v559_v35  ;;  %2872 = vst [vmem:[#allocation5_spill] sm:$0xff] %v2522_v59  ;;  %v241_v39 = vunpack.c.l.bf16 %v2493_v33  ;;  %v427_v35 = vunpack.c.l.bf16 %v2498_v22 }
  0x99   :  { %942 = vmatpush.msra.mxu0 %v265_v63  ;;  %983 = vmatpush.msra.mxu2 %v451_v48  ;;  %v2529_v63 = vld [vmem:[%s2762_s1 + $0x208] sm:$0xff]  ;;  %v2534_v48 = vld [vmem:[%s2762_s1 + $0x4f0] sm:$0xff] }
  0x9a   :  { %961 = vmatpush.msra.mxu1 %v367_v4  ;;  %1002 = vmatpush.msra.mxu3 %v553_v10  ;;  %2873 = vst [vmem:[#allocation8_spill] sm:$0xff] %v2529_v63  ;;  %v343_v4 = vunpack.c.l.bf16 %v2505_v29  ;;  %v529_v10 = vunpack.c.l.bf16 %v2510_v17 }
  0x9b   :  { %943 = vmatpush.msra.mxu0 %v259_v21  ;;  %984 = vmatpush.msra.mxu2 %v445_v42  ;;  %2874 = vst [vmem:[#allocation6_spill] sm:$0xff] %v2534_v48  ;;  %v2541_v21 = vld [vmem:[%s2762_s1 + $0x58] sm:$0xff]  ;;  %v2546_v42 = vld [vmem:[%s2762_s1 + $0x340] sm:$0xff] }
  0x9c   :  { %962 = vmatpush.msra.mxu1 %v361_v0  ;;  %1003 = vmatpush.msra.mxu3 %v547_v7  ;;  %2875 = vst [vmem:[#allocation7_spill] sm:$0xff] %v2541_v21  ;;  %v235_v0 = vunpack.c.l.bf16 %v2517_v15  ;;  %v421_v7 = vunpack.c.l.bf16 %v2522_v59  ;;  %v229_v59 = vunpack.c.l.bf16 %v2541_v21 }
  0x9d   :  { %944 = vmatpush.msra.mxu0 %v253_v24  ;;  %985 = vmatpush.msra.mxu2 %v439_v25  ;;  %2876 = vst [vmem:[#allocation19_spill] sm:$0xff] %v2546_v42  ;;  %v2553_v24 = vld [vmem:[%s2762_s1 + $0x1f0] sm:$0xff]  ;;  %v2558_v25 = vld [vmem:[%s2762_s1 + $0x4d8] sm:$0xff] }
  0x9e   :  { %963 = vmatpush.msra.mxu1 %v355_v11  ;;  %1004 = vmatpush.msra.mxu3 %v541_v16  ;;  %2877 = vst [vmem:[#allocation9_spill] sm:$0xff] %v2553_v24  ;;  %v337_v11 = vunpack.c.l.bf16 %v2529_v63  ;;  %v523_v16 = vunpack.c.l.bf16 %v2534_v48  ;;  %v2582_v48 = vld [vmem:[%s2762_s1 + $0x4c0] sm:$0xff]  ;;  %v331_v63 = vunpack.c.l.bf16 %v2553_v24 }
  0x9f   :  { %945 = vmatpush.msra.mxu0 %v247_v62  ;;  %986 = vmatpush.msra.mxu2 %v433_v51  ;;  %2878 = vst [vmem:[#allocation12_spill] sm:$0xff] %v2558_v25  ;;  %v2565_v62 = vld [vmem:[%s2762_s1 + $0x40] sm:$0xff]  ;;  %v2570_v51 = vld [vmem:[%s2762_s1 + $0x328] sm:$0xff] }
  0xa0   :  { %964 = vmatpush.msra.mxu1 %v349_v46  ;;  %1005 = vmatpush.msra.mxu3 %v535_v3  ;;  %2879 = vst [vmem:[#allocation10_spill] sm:$0xff] %v2565_v62  ;;  %v415_v46 = vunpack.c.l.bf16 %v2546_v42  ;;  %v2577_v3 = vld [vmem:[%s2762_s1 + $0x1d8] sm:$0xff]  ;;  %v2594_v42 = vld [vmem:[%s2762_s1 + $0x310] sm:$0xff]  ;;  %v223_v21 = vunpack.c.l.bf16 %v2565_v62 }
  0xa1   :  { %2880 = vst [vmem:[#allocation11_spill] sm:$0xff] %v2570_v51  ;;  %946 = vmatpush.msra.mxu0 %v241_v39  ;;  %987 = vmatpush.msra.mxu2 %v427_v35  ;;  %v517_v39 = vunpack.c.l.bf16 %v2558_v25  ;;  %v2589_v35 = vld [vmem:[%s2762_s1 + $0x28] sm:$0xff]  ;;  %v325_v24 = vunpack.c.l.bf16 %v2577_v3  ;;  %v403_v62 = vunpack.c.l.bf16 %v2594_v42 }
  0xa2   :  { %2881 = vst [vmem:[#allocation13_spill] sm:$0xff] %v2582_v48  ;;  %965 = vmatpush.msra.mxu1 %v343_v4  ;;  %1006 = vmatpush.msra.mxu3 %v529_v10  ;;  %v409_v4 = vunpack.c.l.bf16 %v2570_v51  ;;  %v2601_v10 = vld [vmem:[%s2762_s1 + $0x1c0] sm:$0xff]  ;;  %v2606_v25 = vld [vmem:[%s2762_s1 + $0x4a8] sm:$0xff]  ;;  %v217_v51 = vunpack.c.l.bf16 %v2589_v35 }
  0xa3   :  { %2882 = vst [vmem:[#allocation14_spill] sm:$0xff] %v2589_v35  ;;  %947 = vmatpush.msra.mxu0 %v235_v0  ;;  %988 = vmatpush.msra.mxu2 %v421_v7  ;;  %v511_v0 = vunpack.c.l.bf16 %v2582_v48  ;;  %v2613_v7 = vld [vmem:[%s2762_s1 + $0x10] sm:$0xff]  ;;  %v319_v48 = vunpack.c.l.bf16 %v2601_v10 }
  0xa4   :  { %2883 = vst [vmem:[#allocation16_spill] sm:$0xff] %v2594_v42  ;;  %966 = vmatpush.msra.mxu1 %v337_v11  ;;  %1007 = vmatpush.msra.mxu3 %v523_v16  ;;  %v2620_v11 = vld [vmem:[%s2762_s1 + $0x1a8] sm:$0xff]  ;;  %v2625_v16 = vld [vmem:[%s2762_s1 + $0x490] sm:$0xff]  ;;  %v211_v42 = vunpack.c.l.bf16 %v2613_v7 }
  0xa5   :  { %2884 = vst [vmem:[#allocation15_spill] sm:$0xff] %v2613_v7  ;;  %948 = vmatpush.msra.mxu0 %v229_v59  ;;  %989 = vmatpush.msra.mxu2 %v415_v46  ;;  %v505_v59 = vunpack.c.l.bf16 %v2606_v25  ;;  %v494_v46 = vunpack.c.h.bf16 %v2247_v49  ;;  %v2634_v35 = vld [vmem:[%s2762_s1 + $0x190] sm:$0xff]  ;;  %v590_v49 = vunpack.c.h.bf16 %v2267_v54  ;;  %v392_v54 = vunpack.c.h.bf16 %v2311_v30 }
  0xa6   :  { %967 = vmatpush.msra.mxu1 %v331_v63  ;;  %1008 = vmatpush.msra.mxu3 %v517_v39  ;;  %v313_v63 = vunpack.c.l.bf16 %v2620_v11  ;;  %v499_v39 = vunpack.c.l.bf16 %v2625_v16  ;;  %v307_v7 = vunpack.c.l.bf16 %v2634_v35  ;;  %v278_v30 = vunpack.c.h.bf16 %v2348_v28 }
  0xa7   :  { %949 = vmatpush.msra.mxu0 %v223_v21  ;;  %990 = vmatpush.msra.mxu2 %v409_v4  ;;  %v302_v21 = vunpack.c.h.bf16 %v2255_v9  ;;  %v488_v4 = vunpack.c.h.bf16 %v2262_v26  ;;  %v584_v9 = vunpack.c.h.bf16 %v2292_v1  ;;  %v290_v26 = vunpack.c.h.bf16 %v2299_v6 }
  0xa8   :  { %968 = vmatpush.msra.mxu1 %v325_v24  ;;  %1009 = vmatpush.msra.mxu3 %v511_v0  ;;  %v296_v24 = vunpack.c.h.bf16 %v2273_v50  ;;  %v398_v0 = vunpack.c.h.bf16 %v2287_v5  ;;  %v578_v50 = vunpack.c.h.bf16 %v2316_v19  ;;  %v284_v5 = vunpack.c.h.bf16 %v2324_v60 }
  0xa9   :  { %950 = vmatpush.msra.mxu0 %v217_v51  ;;  %991 = vmatpush.msra.mxu2 %v403_v62  ;;  %v482_v62 = vunpack.c.h.bf16 %v2279_v58  ;;  %v386_v58 = vunpack.c.h.bf16 %v2336_v44  ;;  %v470_v1 = vunpack.c.h.bf16 %v2329_v34  ;;  %v572_v6 = vunpack.c.h.bf16 %v2341_v53  ;;  %v2659_v44 = vld.sshfl [vmem:[#allocation1 + $0x10] sm:$0xff pattern:$0x73625140] }
  0xaa   :  { %969 = vmatpush.msra.mxu1 %v319_v48  ;;  %1010 = vmatpush.msra.mxu3 %v505_v59  ;;  %v476_v48 = vunpack.c.h.bf16 %v2304_v8  ;;  %v380_v8 = vunpack.c.h.bf16 %v2361_v41  ;;  %v464_v19 = vunpack.c.h.bf16 %v2353_v55  ;;  %v566_v60 = vunpack.c.h.bf16 %v2366_v12  ;;  %v2665_v41 = vld.sshfl [vmem:[#allocation1] sm:$0xff pattern:$0x73625140] }
  0xab   :  { %1056 = vmatpush.msrb.mxu2 %v494_v46  ;;  %951 = vmatpush.msra.mxu0 %v211_v42  ;;  %v272_v34 = vunpack.c.h.bf16 %v2373_v32  ;;  %v374_v53 = vunpack.c.h.bf16 %v2385_v56  ;;  %v458_v28 = vunpack.c.h.bf16 %v2378_v2  ;;  %v560_v55 = vunpack.c.h.bf16 %v2390_v14  ;;  %v2670_v42 = vld.sshfl [vmem:[#allocation1 + $0x18] sm:$0xff pattern:$0x73625140]  ;;  %v2885_v46 = vld [vmem:[#allocation8_spill] sm:$0xff] }
  0xac   :  { %970 = vmatpush.msra.mxu1 %v313_v63  ;;  %1011 = vmatpush.msra.mxu3 %v499_v39  ;;  %v266_v12 = vunpack.c.h.bf16 %v2397_v20  ;;  %v368_v32 = vunpack.c.h.bf16 %v2409_v40  ;;  %v452_v2 = vunpack.c.h.bf16 %v2402_v23  ;;  %v554_v56 = vunpack.c.h.bf16 %v2414_v31  ;;  %v2887_v39 = vld [vmem:[#allocation6_spill] sm:$0xff] }
  0xad   :  { %1016 = vmatpush.msrb.mxu0 %v302_v21  ;;  %1057 = vmatpush.msrb.mxu2 %v488_v4  ;;  %v260_v14 = vunpack.c.h.bf16 %v2421_v43  ;;  %v362_v51 = vunpack.c.h.bf16 %v2433_v13  ;;  %v446_v20 = vunpack.c.h.bf16 %v2426_v45  ;;  %v548_v40 = vunpack.c.h.bf16 %v2438_v57  ;;  %v2889_v4 = vld [vmem:[#allocation9_spill] sm:$0xff] }
  0xae   :  { %1076 = vmatpush.msrb.mxu3 %v590_v49  ;;  %971 = vmatpush.msra.mxu1 %v307_v7  ;;  %v2677_v7 = vld.sshfl [vmem:[#allocation1 + $0x8] sm:$0xff pattern:$0x73625140]  ;;  %v254_v23 = vunpack.c.h.bf16 %v2445_v27  ;;  %v356_v31 = vunpack.c.h.bf16 %v2457_v47  ;;  %v440_v43 = vunpack.c.h.bf16 %v2450_v38  ;;  %v542_v13 = vunpack.c.h.bf16 %v2462_v37 }
  0xaf   :  { %1017 = vmatpush.msrb.mxu0 %v296_v24  ;;  %1058 = vmatpush.msrb.mxu2 %v482_v62  ;;  %v248_v59 = vunpack.c.h.bf16 %v2469_v52  ;;  %v350_v45 = vunpack.c.h.bf16 %v2481_v36  ;;  %v434_v57 = vunpack.c.h.bf16 %v2474_v18  ;;  %v536_v27 = vunpack.c.h.bf16 %v2486_v61  ;;  %v2886_v61 = vld [vmem:[#allocation5_spill] sm:$0xff]  ;;  %v2891_v24 = vld [vmem:[#allocation12_spill] sm:$0xff] }
  0xb0   :  { %1036 = vmatpush.msrb.mxu1 %v398_v0  ;;  %1077 = vmatpush.msrb.mxu3 %v584_v9  ;;  %v242_v47 = vunpack.c.h.bf16 %v2493_v33  ;;  %v344_v38 = vunpack.c.h.bf16 %v2505_v29  ;;  %v428_v37 = vunpack.c.h.bf16 %v2498_v22  ;;  %v530_v52 = vunpack.c.h.bf16 %v2510_v17  ;;  %v2888_v29 = vld [vmem:[#allocation7_spill] sm:$0xff]  ;;  %v2892_v0 = vld [vmem:[#allocation10_spill] sm:$0xff] }
  0xb1   :  { %1018 = vmatpush.msrb.mxu0 %v290_v26  ;;  %1059 = vmatpush.msrb.mxu2 %v476_v48  ;;  %v236_v36 = vunpack.c.h.bf16 %v2517_v15  ;;  %v338_v18 = vunpack.c.h.bf16 %v2885_v46  ;;  %v422_v63 = vunpack.c.h.bf16 %v2886_v61  ;;  %v524_v33 = vunpack.c.h.bf16 %v2887_v39  ;;  %v2890_v17 = vld [vmem:[#allocation19_spill] sm:$0xff]  ;;  %v2894_v48 = vld [vmem:[#allocation13_spill] sm:$0xff] }
  0xb2   :  { %1037 = vmatpush.msrb.mxu1 %v392_v54  ;;  %1078 = vmatpush.msrb.mxu3 %v578_v50  ;;  %v230_v21 = vunpack.c.h.bf16 %v2888_v29  ;;  %v332_v22 = vunpack.c.h.bf16 %v2889_v4  ;;  %v416_v49 = vunpack.c.h.bf16 %v2890_v17  ;;  %v518_v15 = vunpack.c.h.bf16 %v2891_v24  ;;  %v2893_v26 = vld [vmem:[#allocation11_spill] sm:$0xff] }
  0xb3   :  { %1019 = vmatpush.msrb.mxu0 %v284_v5  ;;  %1060 = vmatpush.msrb.mxu2 %v470_v1  ;;  %v224_v62 = vunpack.c.h.bf16 %v2892_v0  ;;  %v326_v9 = vunpack.c.h.bf16 %v2577_v3  ;;  %v410_v54 = vunpack.c.h.bf16 %v2893_v26  ;;  %v512_v50 = vunpack.c.h.bf16 %v2894_v48  ;;  %v2895_v5 = vld [vmem:[#allocation14_spill] sm:$0xff]  ;;  %v2897_v3 = vld [vmem:[#allocation15_spill] sm:$0xff] }
  0xb4   :  { %1038 = vmatpush.msrb.mxu1 %v386_v58  ;;  %1079 = vmatpush.msrb.mxu3 %v572_v6  ;;  %v218_v58 = vunpack.c.h.bf16 %v2895_v5  ;;  %v320_v1 = vunpack.c.h.bf16 %v2601_v10  ;;  %v2896_v6 = vld [vmem:[#allocation16_spill] sm:$0xff]  ;;  %v308_v10 = vunpack.c.h.bf16 %v2634_v35 }
  0xb5   :  { %992 = vmatmul.f32.vlgmr.msra.gmra.mxu2 %v2659_v44  ;;  %1020 = vmatpush.msrb.mxu0 %v278_v30  ;;  %v404_v30 = vunpack.c.h.bf16 %v2896_v6 }
  0xb6   :  { %1039 = vmatpush.msrb.mxu1 %v380_v8  ;;  %1061 = vmatpush.msrb.mxu2 %v464_v19  ;;  %v506_v8 = vunpack.c.h.bf16 %v2606_v25  ;;  %v212_v19 = vunpack.c.h.bf16 %v2897_v3  ;;  %v633_v25 = vpop.f32.mrf.mxu0 }
  0xb7   :  { %1080 = vmatpush.msrb.mxu3 %v566_v60  ;;  %952 = vmatmul.f32.vlgmr.msra.gmra.mxu0 %v2665_v41  ;;  %v314_v60 = vunpack.c.h.bf16 %v2620_v11  ;;  %v653_v11 = vpop.f32.mrf.mxu1 }
  0xb8   :  { %1012 = vmatmul.f32.vlgmr.msra.gmra.mxu3 %v2670_v42  ;;  %1021 = vmatpush.msrb.mxu0 %v272_v34  ;;  %v500_v34 = vunpack.c.h.bf16 %v2625_v16  ;;  %v2721_v16 = vld [vmem:[%s2763_s2] sm:$0x3f]  ;;  %s1310_s2 = smov [#allocation2]  }
  0xb9   :  { %1040 = vmatpush.msrb.mxu1 %v374_v53  ;;  %1062 = vmatpush.msrb.mxu2 %v458_v28  ;;  %v595_v35 = vperm.slane %v2721_v16, 1  ;;  %s1238_s11 = sshll.u32 %s1310_s2, 4  ;;  %s1239_s11 = int_to_ptr.vmem [resolvable:$true] %s1238_s11 }
  0xba   :  { %1081 = vmatpush.msrb.mxu3 %v560_v55  ;;  %972 = vmatmul.f32.vlgmr.msra.gmra.mxu1 %v2677_v7 }
  0xbb   :  { %1022 = vmatpush.msrb.mxu0 %v266_v12  ;;  %1041 = vmatpush.msrb.mxu1 %v368_v32  ;;  %v693_v55 = vpop.f32.mrf.mxu3 }
  0xbc   :  { %1063 = vmatpush.msrb.mxu2 %v452_v2  ;;  %1082 = vmatpush.msrb.mxu3 %v554_v56 }
  0xbd   :  { %1023 = vmatpush.msrb.mxu0 %v260_v14  ;;  %1042 = vmatpush.msrb.mxu1 %v362_v51  ;;  %v596_v51 = vperm.slane %v2721_v16, 2 }
  0xbe   :  { %1064 = vmatpush.msrb.mxu2 %v446_v20  ;;  %1083 = vmatpush.msrb.mxu3 %v548_v40 }
  0xbf   :  { %1024 = vmatpush.msrb.mxu0 %v254_v23  ;;  %1043 = vmatpush.msrb.mxu1 %v356_v31 }
  0xc0   :  { %1065 = vmatpush.msrb.mxu2 %v440_v43  ;;  %1084 = vmatpush.msrb.mxu3 %v542_v13 }
  0xc1   :  { %1025 = vmatpush.msrb.mxu0 %v248_v59  ;;  %1044 = vmatpush.msrb.mxu1 %v350_v45 }
  0xc2   :  { %1066 = vmatpush.msrb.mxu2 %v434_v57  ;;  %1085 = vmatpush.msrb.mxu3 %v536_v27 }
  0xc3   :  { %1026 = vmatpush.msrb.mxu0 %v242_v47  ;;  %1045 = vmatpush.msrb.mxu1 %v344_v38 }
  0xc4   :  { %1067 = vmatpush.msrb.mxu2 %v428_v37  ;;  %1086 = vmatpush.msrb.mxu3 %v530_v52  ;;  %v713_v53 = vpop.f32.mrf.mxu0 }
  0xc5   :  { %1027 = vmatpush.msrb.mxu0 %v236_v36  ;;  %1046 = vmatpush.msrb.mxu1 %v338_v18  ;;  %v714_v28 = vadd.f32 %v713_v53, %v595_v35  ;;  %v597_v36 = vperm.slane %v2721_v16, 3 }
  0xc6   :  { %1068 = vmatpush.msrb.mxu2 %v422_v63  ;;  %1087 = vmatpush.msrb.mxu3 %v524_v33 }
  0xc7   :  { %1028 = vmatpush.msrb.mxu0 %v230_v21  ;;  %1047 = vmatpush.msrb.mxu1 %v332_v22 }
  0xc8   :  { %1069 = vmatpush.msrb.mxu2 %v416_v49  ;;  %1088 = vmatpush.msrb.mxu3 %v518_v15  ;;  %v733_v12 = vpop.f32.mrf.mxu1 }
  0xc9   :  { %1029 = vmatpush.msrb.mxu0 %v224_v62  ;;  %1048 = vmatpush.msrb.mxu1 %v326_v9  ;;  %v734_v32 = vadd.f32 %v733_v12, %v714_v28 }
  0xca   :  { %1070 = vmatpush.msrb.mxu2 %v410_v54  ;;  %1089 = vmatpush.msrb.mxu3 %v512_v50 }
  0xcb   :  { %1030 = vmatpush.msrb.mxu0 %v218_v58  ;;  %1049 = vmatpush.msrb.mxu1 %v320_v1  ;;  %v773_v14 = vpop.f32.mrf.mxu3 }
  0xcc   :  { %1071 = vmatpush.msrb.mxu2 %v404_v30  ;;  %1090 = vmatpush.msrb.mxu3 %v506_v8 }
  0xcd   :  { %1072 = vmatmul.f32.vlgmr.msrb.gmra.mxu2 %v2659_v44  ;;  %1031 = vmatpush.msrb.mxu0 %v212_v19  ;;  %v673_v44 = vpop.f32.mrf.mxu2 }
  0xce   :  { %1050 = vmatpush.msrb.mxu1 %v314_v60  ;;  %1091 = vmatpush.msrb.mxu3 %v500_v34 }
  0xcf   :  { %1032 = vmatmul.f32.vlgmr.msrb.gmra.mxu0 %v2665_v41  ;;  %1092 = vmatmul.f32.vlgmr.msrb.gmra.mxu3 %v2670_v42  ;;  %v594_v41 = vperm.slane %v2721_v16, 0 }
  0xd0   :  { %1051 = vmatpush.msrb.mxu1 %v308_v10 }
  0xd1   :  { %1052 = vmatmul.f32.vlgmr.msrb.gmra.mxu1 %v2677_v7  ;;  %v634_v2 = vadd.f32 %v633_v25, %v594_v41 }
  0xd3   :  { %v654_v7 = vadd.f32 %v653_v11, %v634_v2 }
  0xd5   :  { %v753_v42 = vpop.f32.mrf.mxu2  ;;  %v674_v31 = vadd.f32 %v673_v44, %v654_v7 }
  0xd6   :  { %v754_v56 = vadd.f32 %v753_v42, %v734_v32 }
  0xd7   :  { %v694_v27 = vadd.f32 %v693_v55, %v674_v31 }
  0xd8   :  { %v774_v20 = vadd.f32 %v773_v14, %v754_v56 }
  0xd9   :  { %v1249_v52 = vmul.f32 -1.442695, %v694_v27 }
  0xda   :  { %v1250_v13 = vmul.f32 -1.442695, %v774_v20 }
  0xdc   :  { %1256 = vpow2.f32 %v1250_v13 }
  0xe2   :  { %v1257_v46 = vpop.eup %1256 }
  0xe3   :  { %v1115_v61 = vadd.f32 1.0, %v1257_v46  ;;  %v598_v46 = vperm.slane %v2721_v16, 4 }
  0xe5   :  { %vm1140_vm0 = vweird.f32 %v1115_v61  ;;  %v1146_v19 = vand.u32 2147483648, %v1115_v61  ;;  %v1144_v34 = vand.u32 2147483647, %v1115_v61 }
  0xe7   :  { %v1147_v55 = vor.u32 1.1754944e-38, %v1146_v19  ;;  %vm1145_vm8 = vcmp.eq.f32.partialorder %v1144_v34, 8.507059e+37 }
  0xf8   :  { %v793_v40 = vpop.f32.mrf.mxu0 }
  0xf9   :  { %v794_v23 = vadd.f32 %v793_v40, %v596_v51 }
  0xfb   :  { %v813_v43 = vpop.f32.mrf.mxu1 }
  0xfc   :  { %v814_v59 = vadd.f32 %v813_v43, %v794_v23  ;;  %v833_v45 = vpop.f32.mrf.mxu2 }
  0xfe   :  { %v834_v57 = vadd.f32 %v833_v45, %v814_v59 }
  0xff   :  { %v853_v47 = vpop.f32.mrf.mxu3 }
 0x100   :  { %v854_v38 = vadd.f32 %v853_v47, %v834_v57 }
 0x102   :  { %v1251_v37 = vmul.f32 -1.442695, %v854_v38 }
 0x104   :  { %1258 = vpow2.f32 %v1251_v37 }
 0x105   :  { %1260 = vpow2.f32 %v1249_v52 }
 0x106   :  { %1262 = vrcp.f32 %v1115_v61 }
 0x108   :  { %v873_v18 = vpop.f32.mrf.mxu0 }
 0x109   :  { %v874_v63 = vadd.f32 %v873_v18, %v597_v36 }
 0x10a   :  { %v1259_v39 = vpop.eup %1258 }
 0x10b   :  { %v1116_v33 = vadd.f32 1.0, %v1259_v39  ;;  %v1261_v4 = vpop.eup %1260 }
 0x10c   :  { %v893_v29 = vpop.f32.mrf.mxu1  ;;  %v913_v21 = vpop.f32.mrf.mxu2  ;;  %v1114_v24 = vadd.f32 1.0, %v1261_v4 }
 0x10d   :  { %v894_v22 = vadd.f32 %v893_v29, %v874_v63  ;;  %1264 = vrcp.f32 %v1116_v33  ;;  %v1263_v0 = vpop.eup %1262  ;;  %vm1155_vm3 = vweird.f32 %v1116_v33  ;;  %v1161_v11 = vand.u32 2147483648, %v1116_v33 }
 0x10e   :  { %1266 = vrcp.f32 %v1114_v24  ;;  %v1136_v26 = vmul.f32 %v1263_v0, %v1115_v61  ;;  %vm1141_vm1 = vweird.f32 %v1263_v0  ;;  %vm1125_vm5 = vweird.f32 %v1114_v24 }
 0x10f   :  { %v914_v17 = vadd.f32 %v913_v21, %v894_v22  ;;  %v933_v49 = vpop.f32.mrf.mxu3  ;;  %vm2727_vm2 = vmor %vm1140_vm0, %vm1141_vm1  ;;  %v1159_v28 = vand.u32 2147483647, %v1116_v33  ;;  %v1162_v56 = vor.u32 1.1754944e-38, %v1161_v11  ;;  %v1129_v14 = vand.u32 2147483647, %v1114_v24 }
 0x110   :  { %v1137_v50 = vsub.f32 1.0, %v1136_v26  ;;  %v1131_v51 = vand.u32 2147483648, %v1114_v24  ;;  %vm1220_vm0 = vcmask 1041408   ;;  %vm1222_vm1 = vcmask 1045508  }
 0x111   :  { %v934_v15 = vadd.f32 %v933_v49, %v914_v17  ;;  %vm1160_vm12 = vcmp.eq.f32.partialorder %v1159_v28, 8.507059e+37  ;;  %vm1130_vm15 = vcmp.eq.f32.partialorder %v1129_v14, 8.507059e+37 }
 0x112   :  { %v1138_v30 = vmul.f32 %v1263_v0, %v1137_v50  ;;  %v1132_v59 = vor.u32 1.1754944e-38, %v1131_v51 }
 0x113   :  { %v1252_v62 = vmul.f32 -1.442695, %v934_v15  ;;  %v1265_v9 = vpop.eup %1264  ;;  %v599_v15 = vperm.slane %v2721_v16, 5 }
 0x114   :  { %v1151_v54 = vmul.f32 %v1265_v9, %v1116_v33  ;;  %v1267_v48 = vpop.eup %1266  ;;  %v1139_v60 = vadd.f32 %v1263_v0, %v1138_v30  ;;  %vm1156_vm4 = vweird.f32 %v1265_v9 }
 0x115   :  { %1268 = vpow2.f32 %v1252_v62  ;;  %v1121_v1 = vmul.f32 %v1267_v48, %v1114_v24  ;;  %vm1126_vm6 = vweird.f32 %v1267_v48  ;;  %vm2731_vm7 = vmor %vm1155_vm3, %vm1156_vm4 }
 0x116   :  { %v1152_v6 = vsub.f32 1.0, %v1151_v54  ;;  %v1143_v32 = vsel %vm2727_vm2, %v1263_v0, %v1139_v60  ;;  %vm2739_vm11 = vmor %vm1125_vm5, %vm1126_vm6  ;;  %vm1224_vm2 = vcmask 1043456  }
 0x117   :  { %v1122_v8 = vsub.f32 1.0, %v1121_v1  ;;  %v1148_v43 = vsel %vm1145_vm8, %v1147_v55, %v1143_v32 }
 0x118   :  { %v1153_v3 = vmul.f32 %v1265_v9, %v1152_v6  ;;  %v1216_v47 = vrot.slane %v1148_v43, 6 }
 0x119   :  { %v1123_v35 = vmul.f32 %v1267_v48, %v1122_v8 }
 0x11a   :  { %v1154_v53 = vadd.f32 %v1265_v9, %v1153_v3 }
 0x11b   :  { %v1269_v5 = vpop.eup %1268  ;;  %v1124_v20 = vadd.f32 %v1267_v48, %v1123_v35 }
 0x11c   :  { %v1117_v58 = vadd.f32 1.0, %v1269_v5  ;;  %v1158_v23 = vsel %vm2731_vm7, %v1265_v9, %v1154_v53 }
 0x11d   :  { %v1163_v45 = vsel %vm1160_vm12, %v1162_v56, %v1158_v23  ;;  %v1128_v57 = vsel %vm2739_vm11, %v1267_v48, %v1124_v20 }
 0x11e   :  { %1270 = vrcp.f32 %v1117_v58  ;;  %v1176_v41 = vand.u32 2147483648, %v1117_v58  ;;  %vm1170_vm9 = vweird.f32 %v1117_v58  ;;  %v1174_v2 = vand.u32 2147483647, %v1117_v58 }
 0x11f   :  { %v1217_v37 = vrot.slane %v1163_v45, 4  ;;  %v1133_v36 = vsel %vm1130_vm15, %v1132_v59, %v1128_v57 }
 0x120   :  { %v1177_v31 = vor.u32 1.1754944e-38, %v1176_v41  ;;  %vm1175_vm14 = vcmp.eq.f32.partialorder %v1174_v2, 8.507059e+37  ;;  %v1221_v18 = vsel %vm1220_vm0, %v1133_v36, %v1216_v47 }
 0x124   :  { %v1271_v25 = vpop.eup %1270 }
 0x125   :  { %v1166_v44 = vmul.f32 %v1271_v25, %v1117_v58  ;;  %vm1171_vm10 = vweird.f32 %v1271_v25 }
 0x126   :  { %vm1172_vm13 = vmor %vm1170_vm9, %vm1171_vm10  ;;  %vm1230_vm9 = vcmask 158722  }
 0x127   :  { %v1167_v42 = vsub.f32 1.0, %v1166_v44  ;;  %vm1231_vm12 = vmor %vm1230_vm9, %vm1220_vm0 }
 0x129   :  { %v1168_v7 = vmul.f32 %v1271_v25, %v1167_v42 }
 0x12b   :  { %v1169_v13 = vadd.f32 %v1271_v25, %v1168_v7 }
 0x12d   :  { %v1173_v27 = vsel %vm1172_vm13, %v1271_v25, %v1169_v13 }
 0x12e   :  { %v1178_v38 = vsel %vm1175_vm14, %v1177_v31, %v1173_v27 }
 0x12f   :  { %v1218_v52 = vrot.slane %v1178_v38, 2 }
 0x131   :  { %v1223_v61 = vsel %vm1222_vm1, %v1217_v37, %v1218_v52 }
 0x132   :  { %v1225_v63 = vsel %vm1224_vm2, %v1221_v18, %v1223_v61 }
 0x133   :  { %1229 = vst [vmem:[#allocation2] sm:$0xff] %v1225_v63 }
 0x134   :  { %v953_v39 = vpop.f32.mrf.mxu0 }
 0x135   :  { %v954_v33 = vadd.f32 %v953_v39, %v598_v46 }
 0x137   :  { %v973_v29 = vpop.f32.mrf.mxu1 }
 0x138   :  { %v974_v21 = vadd.f32 %v973_v29, %v954_v33  ;;  %v993_v4 = vpop.f32.mrf.mxu2 }
 0x13a   :  { %v994_v22 = vadd.f32 %v993_v4, %v974_v21 }
 0x13b   :  { %v1013_v17 = vpop.f32.mrf.mxu3 }
 0x13c   :  { %v1014_v49 = vadd.f32 %v1013_v17, %v994_v22 }
 0x13e   :  { %v1253_v24 = vmul.f32 -1.442695, %v1014_v49 }
 0x140   :  { %1272 = vpow2.f32 %v1253_v24 }
 0x146   :  { %v1273_v26 = vpop.eup %1272 }
 0x147   :  { %v1118_v5 = vadd.f32 1.0, %v1273_v26 }
 0x149   :  { %1274 = vrcp.f32 %v1118_v5  ;;  %vm1185_vm3 = vweird.f32 %v1118_v5  ;;  %v1189_v35 = vand.u32 2147483647, %v1118_v5  ;;  %v1191_v44 = vand.u32 2147483648, %v1118_v5 }
 0x14b   :  { %v1192_v32 = vor.u32 1.1754944e-38, %v1191_v44  ;;  %vm1190_vm10 = vcmp.eq.f32.partialorder %v1189_v35, 8.507059e+37 }
 0x14c   :  { %v1033_v0 = vpop.f32.mrf.mxu0 }
 0x14d   :  { %v1034_v62 = vadd.f32 %v1033_v0, %v599_v15 }
 0x14e   :  { %v1053_v9 = vpop.f32.mrf.mxu1 }
 0x14f   :  { %v1054_v54 = vadd.f32 %v1053_v9, %v1034_v62  ;;  %v1275_v30 = vpop.eup %1274 }
 0x150   :  { %v1073_v48 = vpop.f32.mrf.mxu2  ;;  %v1181_v19 = vmul.f32 %v1275_v30, %v1118_v5  ;;  %vm1186_vm4 = vweird.f32 %v1275_v30 }
 0x151   :  { %v1074_v50 = vadd.f32 %v1073_v48, %v1054_v54  ;;  %vm2750_vm6 = vmor %vm1185_vm3, %vm1186_vm4 }
 0x152   :  { %v1093_v58 = vpop.f32.mrf.mxu3  ;;  %v1182_v60 = vsub.f32 1.0, %v1181_v19 }
 0x153   :  { %v1094_v1 = vadd.f32 %v1093_v58, %v1074_v50 }
 0x154   :  { %v1183_v10 = vmul.f32 %v1275_v30, %v1182_v60 }
 0x155   :  { %v1254_v6 = vmul.f32 -1.442695, %v1094_v1 }
 0x156   :  { %v1184_v28 = vadd.f32 %v1275_v30, %v1183_v10 }
 0x157   :  { %1276 = vpow2.f32 %v1254_v6 }
 0x158   :  { %v1188_v2 = vsel %vm2750_vm6, %v1275_v30, %v1184_v28 }
 0x159   :  { %v1193_v7 = vsel %vm1190_vm10, %v1192_v32, %v1188_v2 }
 0x15d   :  { %v1277_v8 = vpop.eup %1276 }
 0x15e   :  { %v1119_v3 = vadd.f32 1.0, %v1277_v8 }
 0x160   :  { %1278 = vrcp.f32 %v1119_v3  ;;  %v1206_v11 = vand.u32 2147483648, %v1119_v3  ;;  %v1204_v55 = vand.u32 2147483647, %v1119_v3  ;;  %vm1200_vm7 = vweird.f32 %v1119_v3 }
 0x162   :  { %v1207_v42 = vor.u32 1.1754944e-38, %v1206_v11  ;;  %vm1205_vm11 = vcmp.eq.f32.partialorder %v1204_v55, 8.507059e+37 }
 0x166   :  { %v1279_v16 = vpop.eup %1278 }
 0x167   :  { %v1196_v34 = vmul.f32 %v1279_v16, %v1119_v3  ;;  %vm1201_vm5 = vweird.f32 %v1279_v16 }
 0x168   :  { %vm1202_vm8 = vmor %vm1200_vm7, %vm1201_vm5 }
 0x169   :  { %v1197_v25 = vsub.f32 1.0, %v1196_v34 }
 0x16b   :  { %v1198_v53 = vmul.f32 %v1279_v16, %v1197_v25 }
 0x16d   :  { %v1199_v41 = vadd.f32 %v1279_v16, %v1198_v53 }
 0x16f   :  { %v1203_v56 = vsel %vm1202_vm8, %v1279_v16, %v1199_v41 }
 0x170   :  { %v1208_v14 = vsel %vm1205_vm11, %v1207_v42, %v1203_v56 }
 0x171   :  { %v1219_v51 = vrot.slane %v1208_v14, 6 }
 0x173   :  { %v1226_v20 = vsel %vm1220_vm0, %v1193_v7, %v1219_v51 }
 0x174   :  { %1232 = vst.msk [vmem:[#allocation2 + $0x8] sm:$0xf] %vm1231_vm12, %v1226_v20 }
 0x175   :  { %1243 = dma.vmem_to_hbm [thread:$0]  %s1239_s11, 192, %s1241_s0, [#allocation3]  }
 0x176   :  { %1308 = dma.done.wait [#allocation3], 192  }
 0x177   :  { %1309 = vsyncadd [#allocation3], 4294967104 }
 0x178   :  { %1248 = vsyncpa [#allocation3], 1 }

</bundles_post_ra>
